<compile_context>
chip_gen: v7x
topology: tpu7x:2x2x1
jax: 0.10.0
libtpu: 0.0.40
codegen_flags: <defaults>
</compile_context>

<pallas_src>
import jax
import jax.numpy as jnp
from jax.experimental import pallas as pl
from jax.experimental.pallas import tpu as pltpu


def _flash_attn_kernel(q_ref, k_ref, v_ref, bias_ref, wo_ref, bo_ref,
                       out_ref, m_scr, l_scr, acc_scr):
    """One (batch, q-tile, k-tile) step of online-softmax attention.

    Channel-major tiles:
      q:    (1, C, tq)  bf16      k/v: (1, C, tk)  bf16
      bias: (1, 1, tk)  f32 additive mask bias (0 or -1e7)
      out:  (1, Cout, tq) f32
    Scratch: m/l (tq, 1) f32, acc (tq, C) f32.
    """
    ki = pl.program_id(2)

    @pl.when(ki == 0)
    def _():
        m_scr[...] = jnp.full_like(m_scr, -jnp.inf)
        l_scr[...] = jnp.zeros_like(l_scr)
        acc_scr[...] = jnp.zeros_like(acc_scr)

    q = q_ref[0]        # (C, tq) bf16
    k = k_ref[0]        # (C, tk) bf16
    v = v_ref[0]        # (C, tk) bf16
    bias = bias_ref[0]  # (1, tk) f32

    # sim[i, j] = sum_c q[c, i] * k[c, j]  -> (tq, tk); bf16 MXU, f32 accumulate.
    sim = jax.lax.dot_general(
        q, k, dimension_numbers=(((0,), (0,)), ((), ())),
        preferred_element_type=jnp.float32)
    sim = sim + bias                                   # additive mask bias

    # Online softmax update (all f32).
    m_prev = m_scr[...]                                # (tq, 1)
    m_new = jnp.maximum(m_prev, jnp.max(sim, axis=-1, keepdims=True))
    alpha = jnp.exp(m_prev - m_new)                    # (tq, 1); exp(-inf)=0 on 1st tile
    e = jnp.exp(sim - m_new)                           # (tq, tk)
    l_scr[...] = alpha * l_scr[...] + jnp.sum(e, axis=-1, keepdims=True)
    m_scr[...] = m_new

    # acc[i, c] = alpha*acc + sum_j e[i, j] * v[c, j]  -> (tq, C); bf16 MXU operands.
    pv = jax.lax.dot_general(
        e.astype(jnp.bfloat16), v,
        dimension_numbers=(((1,), (1,)), ((), ())),
        preferred_element_type=jnp.float32)
    acc_scr[...] = alpha * acc_scr[...] + pv

    @pl.when(ki == pl.num_programs(2) - 1)
    def _():
        # Normalize the small (tq, C) accumulator (never a (tq, Nk) array).
        ctx = acc_scr[...] * pl.reciprocal(l_scr[...], approx=True)   # (tq, C)
        # Output projection: (Cout, C) contracted with (tq, C) -> (Cout, tq).
        out = jax.lax.dot_general(
            wo_ref[...], ctx,
            dimension_numbers=(((1,), (1,)), ((), ())),
            preferred_element_type=jnp.float32) + bo_ref[...]
        out_ref[0] = out.astype(out_ref.dtype)


def _pick_tile(n, cap=512):
    """Largest lane-friendly tile (multiple of 128) dividing n, bounded by cap."""
    if n <= cap:
        return n
    for t in (512, 384, 256, 128):
        if t <= cap and n % t == 0:
            return t
    # TODO(synk): pad N to a multiple of 128 (and mask the pad) instead of a
    # full-extent fallback when H*W is not 128-divisible.
    return n


def self_attention_block(query_feats, key_feats, value_feats, key_mask, params,
                         *, channels, matmul_norm=True, q_tile=None, k_tile=None):
    """query/key/value feats: NCHW; key_mask: (B,1,H,W) float 0/1.

    Params (PyTorch 1x1-conv layout):
      wq: (C, Ciq)  bq: (C, 1)   wk: (C, Cik)  bk: (C, 1)
      wv: (C, Cik)  bv: (C, 1)   wo: (Cout, C) bo: (Cout, 1)
    """
    B, Ciq, Hq, Wq = query_feats.shape
    _, Cik, Hk, Wk = key_feats.shape
    Nq, Nk = Hq * Wq, Hk * Wk

    # NCHW -> (B, C_in, N): pure reshape, channel-major, no transpose.
    xq = query_feats.reshape(B, Ciq, Nq)
    xk = key_feats.reshape(B, Cik, Nk)
    xv = value_feats.reshape(B, Cik, Nk)
    mask = key_mask.reshape(B, 1, Nk).astype(jnp.float32)
    mask_bias = (mask - 1.0) * 10000000.0          # 0 keep, -1e7 masked

    scale = float(channels) ** (-0.5) if matmul_norm else 1.0

    # Tiny Cin=4 1x1-conv projections hoisted out of the kernel (computed once
    # per batch, never per q-tile); softmax scale folded into q; bf16 operands
    # halve HBM traffic and feed the MXU natively.
    q = (jnp.einsum("oi,bin->bon", params["wq"], xq) + params["bq"][None]) * scale
    k = jnp.einsum("oi,bin->bon", params["wk"], xk) + params["bk"][None]
    v = jnp.einsum("oi,bin->bon", params["wv"], xv) + params["bv"][None]
    q = q.astype(jnp.bfloat16)
    k = k.astype(jnp.bfloat16)
    v = v.astype(jnp.bfloat16)

    wo = params["wo"].astype(jnp.float32)
    bo = params["bo"].astype(jnp.float32)
    C = wo.shape[1]
    Cout = wo.shape[0]

    tq = q_tile if q_tile is not None else _pick_tile(Nq)
    tk = k_tile if k_tile is not None else _pick_tile(Nk)
    assert Nq % tq == 0 and Nk % tk == 0, (Nq, tq, Nk, tk)
    n_qt, n_kt = Nq // tq, Nk // tk

    def _rep(shape):
        # replicated (grid-independent) operand
        return pl.BlockSpec(shape, lambda b, qi, ki: (0,) * len(shape))

    out_cm = pl.pallas_call(
        _flash_attn_kernel,
        out_shape=jax.ShapeDtypeStruct((B, Cout, Nq), jnp.float32),
        grid_spec=pltpu.PrefetchScalarGridSpec(
            num_scalar_prefetch=0,
            grid=(B, n_qt, n_kt),
            in_specs=[
                pl.BlockSpec((1, C, tq), lambda b, qi, ki: (b, 0, qi)),
                pl.BlockSpec((1, C, tk), lambda b, qi, ki: (b, 0, ki)),
                pl.BlockSpec((1, C, tk), lambda b, qi, ki: (b, 0, ki)),
                pl.BlockSpec((1, 1, tk), lambda b, qi, ki: (b, 0, ki)),
                _rep((Cout, C)), _rep((Cout, 1)),
            ],
            out_specs=pl.BlockSpec((1, Cout, tq), lambda b, qi, ki: (b, 0, qi)),
            scratch_shapes=[
                pltpu.VMEM((tq, 1), jnp.float32),   # running max m
                pltpu.VMEM((tq, 1), jnp.float32),   # running denom l
                pltpu.VMEM((tq, C), jnp.float32),   # context accumulator
            ],
        ),
        compiler_params=pltpu.CompilerParams(
            dimension_semantics=("parallel", "parallel", "arbitrary")),
    )(q, k, v, mask_bias, wo, bo)

    # (B, Cout, Nq) -> NCHW (B, Cout, Hq, Wq): pure reshape.
    return out_cm.reshape(B, Cout, Hq, Wq)


def _reference(query_feats, key_feats, value_feats, key_mask, params,
               *, channels, matmul_norm=True):
    """Pure-JAX f32 reference mirroring the PyTorch forward."""
    B, Ciq, Hq, Wq = query_feats.shape
    _, Cik, Hk, Wk = key_feats.shape
    Nq, Nk = Hq * Wq, Hk * Wk
    xq = query_feats.reshape(B, Ciq, Nq)
    xk = key_feats.reshape(B, Cik, Nk)
    xv = value_feats.reshape(B, Cik, Nk)
    m = key_mask.reshape(B, 1, Nk).astype(jnp.float32)

    def proj(x, w, b):  # (B, Cin, N) -> (B, Cp, N)
        return jnp.einsum("oi,bin->bon", w, x) + b[None, :, :]

    q = proj(xq, params["wq"], params["bq"])      # (B, C, Nq)
    k = proj(xk, params["wk"], params["bk"])      # (B, C, Nk)
    v = proj(xv, params["wv"], params["bv"])      # (B, C, Nk)
    sim = jnp.einsum("bcq,bck->bqk", q, k)
    if matmul_norm:
        sim = sim * (float(channels) ** (-0.5))
    sim = sim * m + (-10000000.0) * (1.0 - m)
    sim = jax.nn.softmax(sim, axis=-1)
    ctx = jnp.einsum("bqk,bck->bcq", sim, v)      # (B, C, Nq)
    out = jnp.einsum("oi,bin->bon", params["wo"], ctx) + params["bo"][None, :, :]
    Cout = out.shape[1]
    return out.reshape(B, Cout, Hq, Wq)


if __name__ == "__main__":
    key_in_channels = 4
    query_in_channels = 4
    channels = 32
    out_channels = 4
    B, H, W = 2, 16, 16   # N = H*W = 256 -> lane-dense (multiple of 128)

    root = jax.random.PRNGKey(0)
    ks = jax.random.split(root, 12)

    # Inputs (NCHW) and mask (B,1,H,W) of 0/1
    query_feats = jax.random.normal(ks[0], (B, query_in_channels, H, W), jnp.float32)
    key_feats = jax.random.normal(ks[1], (B, key_in_channels, H, W), jnp.float32)
    value_feats = jax.random.normal(ks[2], (B, key_in_channels, H, W), jnp.float32)
    key_mask = (jax.random.uniform(ks[3], (B, 1, H, W)) > 0.3).astype(jnp.float32)

    # 1x1 conv parameters, channel-major (C_out, C_in) as in PyTorch conv weight.
    def init_w(k, cout, cin):
        return 0.1 * jax.random.normal(k, (cout, cin), jnp.float32)

    params = {
        "wq": init_w(ks[4], channels, query_in_channels),
        "bq": 0.1 * jax.random.normal(ks[5], (channels, 1), jnp.float32),
        "wk": init_w(ks[6], channels, key_in_channels),
        "bk": 0.1 * jax.random.normal(ks[7], (channels, 1), jnp.float32),
        "wv": init_w(ks[8], channels, key_in_channels),
        "bv": 0.1 * jax.random.normal(ks[9], (channels, 1), jnp.float32),
        "wo": init_w(ks[10], out_channels, channels),
        "bo": 0.1 * jax.random.normal(ks[11], (out_channels, 1), jnp.float32),
    }

    # q_tile/k_tile = 128 here so the online-softmax (multi k-tile) path is
    # actually exercised at this small shape; defaults pick larger tiles.
    out = self_attention_block(query_feats, key_feats, value_feats, key_mask,
                               params, channels=channels, matmul_norm=True,
                               q_tile=128, k_tile=128)
    out = jax.block_until_ready(out)

    ref = _reference(query_feats, key_feats, value_feats, key_mask,
                     params, channels=channels, matmul_norm=True)
    ref = jax.block_until_ready(ref)

    assert out.shape == (B, out_channels, H, W), out.shape
    # Tolerance loosened for bf16 MXU operands (f32 accumulation, f32 softmax).
    assert jnp.allclose(out, ref, atol=1e-2, rtol=1e-2), float(jnp.max(jnp.abs(out - ref)))
    print("KERNEL_OK")
</pallas_src>

<mosaic_0001>
module attributes {stable_mosaic.version = 11 : i64} {
  func.func @_flash_attn_kernel(%arg0: i32, %arg1: i32, %arg2: i32, %arg3: memref<1x32x128xbf16, #tpu.memory_space<vmem>>, %arg4: memref<1x32x128xbf16, #tpu.memory_space<vmem>>, %arg5: memref<1x32x128xbf16, #tpu.memory_space<vmem>>, %arg6: memref<1x1x128xf32, #tpu.memory_space<vmem>>, %arg7: memref<4x32xf32, #tpu.memory_space<vmem>>, %arg8: memref<4x1xf32, #tpu.memory_space<vmem>>, %arg9: memref<1x4x128xf32, #tpu.memory_space<vmem>>, %arg10: memref<128x1xf32, #tpu.memory_space<vmem>>, %arg11: memref<128x1xf32, #tpu.memory_space<vmem>>, %arg12: memref<128x32xf32, #tpu.memory_space<vmem>>) attributes {dimension_semantics = [#tpu.dimension_semantics<parallel>, #tpu.dimension_semantics<parallel>, #tpu.dimension_semantics<arbitrary>], iteration_bounds = array<i64: 2, 2, 2>, scalar_prefetch = 0 : i64, scratch_operands = 3 : i64, tpu.core_type = #tpu.core_type<tc>, window_params = [{transform_indices = @transform_0, window_bounds = array<i64: 1, 32, 128>}, {transform_indices = @transform_1, window_bounds = array<i64: 1, 32, 128>}, {transform_indices = @transform_2, window_bounds = array<i64: 1, 32, 128>}, {transform_indices = @transform_3, window_bounds = array<i64: 1, 1, 128>}, {pipeline_mode = #tpu.pipeline_mode<synchronous>, transform_indices = @transform_4, window_bounds = array<i64: 4, 32>}, {pipeline_mode = #tpu.pipeline_mode<synchronous>, transform_indices = @transform_5, window_bounds = array<i64: 4, 1>}, {transform_indices = @transform_6, window_bounds = array<i64: 1, 4, 128>}]} {
    %c0_i32 = arith.constant 0 : i32
    %0 = arith.cmpi eq, %arg2, %c0_i32 : i32
    %1 = arith.extui %0 : i1 to i32
    %c0_i32_0 = arith.constant 0 : i32
    %2 = arith.cmpi ne, %1, %c0_i32_0 : i32
    scf.if %2 {
      %cst_28 = arith.constant 0xFF800000 : f32
      %40 = vector.broadcast %cst_28 : f32 to vector<128x1xf32>
      %c0_29 = arith.constant 0 : index
      %c0_30 = arith.constant 0 : index
      %41 = vector.load %arg10[%c0_29, %c0_30] : memref<128x1xf32, #tpu.memory_space<vmem>>, vector<128x1xf32>
      tpu.vector_store %arg10[%c0_29, %c0_30], %40 {strides = array<i32>} : memref<128x1xf32, #tpu.memory_space<vmem>>, vector<128x1xf32>,
      %cst_31 = arith.constant 0.000000e+00 : f32
      %42 = vector.broadcast %cst_31 : f32 to vector<128x1xf32>
      %c0_32 = arith.constant 0 : index
      %c0_33 = arith.constant 0 : index
      %43 = vector.load %arg11[%c0_32, %c0_33] : memref<128x1xf32, #tpu.memory_space<vmem>>, vector<128x1xf32>
      tpu.vector_store %arg11[%c0_32, %c0_33], %42 {strides = array<i32>} : memref<128x1xf32, #tpu.memory_space<vmem>>, vector<128x1xf32>,
      %cst_34 = arith.constant 0.000000e+00 : f32
      %44 = vector.broadcast %cst_34 : f32 to vector<128x32xf32>
      %c0_35 = arith.constant 0 : index
      %c0_36 = arith.constant 0 : index
      %45 = vector.load %arg12[%c0_35, %c0_36] : memref<128x32xf32, #tpu.memory_space<vmem>>, vector<128x32xf32>
      tpu.vector_store %arg12[%c0_35, %c0_36], %44 {strides = array<i32>} : memref<128x32xf32, #tpu.memory_space<vmem>>, vector<128x32xf32>,
    } else {
    }
    %c0 = arith.constant 0 : index
    %c0_1 = arith.constant 0 : index
    %c0_2 = arith.constant 0 : index
    %3 = vector.load %arg3[%c0, %c0_1, %c0_2] : memref<1x32x128xbf16, #tpu.memory_space<vmem>>, vector<1x32x128xbf16>
    %4 = vector.shape_cast %3 : vector<1x32x128xbf16> to vector<32x128xbf16>
    %c0_3 = arith.constant 0 : index
    %c0_4 = arith.constant 0 : index
    %c0_5 = arith.constant 0 : index
    %5 = vector.load %arg4[%c0_3, %c0_4, %c0_5] : memref<1x32x128xbf16, #tpu.memory_space<vmem>>, vector<1x32x128xbf16>
    %6 = vector.shape_cast %5 : vector<1x32x128xbf16> to vector<32x128xbf16>
    %c0_6 = arith.constant 0 : index
    %c0_7 = arith.constant 0 : index
    %c0_8 = arith.constant 0 : index
    %7 = vector.load %arg5[%c0_6, %c0_7, %c0_8] : memref<1x32x128xbf16, #tpu.memory_space<vmem>>, vector<1x32x128xbf16>
    %8 = vector.shape_cast %7 : vector<1x32x128xbf16> to vector<32x128xbf16>
    %c0_9 = arith.constant 0 : index
    %c0_10 = arith.constant 0 : index
    %c0_11 = arith.constant 0 : index
    %9 = vector.load %arg6[%c0_9, %c0_10, %c0_11] : memref<1x1x128xf32, #tpu.memory_space<vmem>>, vector<1x1x128xf32>
    %10 = vector.shape_cast %9 : vector<1x1x128xf32> to vector<1x128xf32>
    %cst = arith.constant dense<0.000000e+00> : vector<128x128xf32>
    %11 = tpu.matmul %4, %6, %cst {dimension_numbers = #tpu.dot_dimension_numbers<[0], [0], [1], [1], [0, 1, 1, 1], [], []>} : vector<32x128xbf16>, vector<32x128xbf16>, vector<128x128xf32> -> vector<128x128xf32>
    %12 = vector.broadcast %10 : vector<1x128xf32> to vector<128x128xf32>
    %13 = arith.addf %11, %12 : vector<128x128xf32>
    %c0_12 = arith.constant 0 : index
    %c0_13 = arith.constant 0 : index
    %14 = vector.load %arg10[%c0_12, %c0_13] : memref<128x1xf32, #tpu.memory_space<vmem>>, vector<128x1xf32>
    %cst_14 = arith.constant dense<0xFF800000> : vector<128xf32>
    %15 = vector.multi_reduction <maximumf>, %13, %cst_14 [1] : vector<128x128xf32> to vector<128xf32>
    %16 = vector.shape_cast %15 : vector<128xf32> to vector<128x1xf32>
    %17 = arith.maximumf %14, %16 : vector<128x1xf32>
    %18 = arith.subf %14, %17 : vector<128x1xf32>
    %19 = math.exp %18 : vector<128x1xf32>
    %20 = vector.broadcast %17 : vector<128x1xf32> to vector<128x128xf32>
    %21 = arith.subf %13, %20 : vector<128x128xf32>
    %22 = math.exp %21 : vector<128x128xf32>
    %c0_15 = arith.constant 0 : index
    %c0_16 = arith.constant 0 : index
    %23 = vector.load %arg11[%c0_15, %c0_16] : memref<128x1xf32, #tpu.memory_space<vmem>>, vector<128x1xf32>
    %24 = arith.mulf %19, %23 : vector<128x1xf32>
    %cst_17 = arith.constant dense<0.000000e+00> : vector<128xf32>
    %25 = vector.multi_reduction <add>, %22, %cst_17 [1] : vector<128x128xf32> to vector<128xf32>
    %26 = vector.shape_cast %25 : vector<128xf32> to vector<128x1xf32>
    %27 = arith.addf %24, %26 : vector<128x1xf32>
    %c0_18 = arith.constant 0 : index
    %c0_19 = arith.constant 0 : index
    %28 = vector.load %arg11[%c0_18, %c0_19] : memref<128x1xf32, #tpu.memory_space<vmem>>, vector<128x1xf32>
    tpu.vector_store %arg11[%c0_18, %c0_19], %27 {strides = array<i32>} : memref<128x1xf32, #tpu.memory_space<vmem>>, vector<128x1xf32>,
    %c0_20 = arith.constant 0 : index
    %c0_21 = arith.constant 0 : index
    %29 = vector.load %arg10[%c0_20, %c0_21] : memref<128x1xf32, #tpu.memory_space<vmem>>, vector<128x1xf32>
    tpu.vector_store %arg10[%c0_20, %c0_21], %17 {strides = array<i32>} : memref<128x1xf32, #tpu.memory_space<vmem>>, vector<128x1xf32>,
    %30 = arith.truncf %22 : vector<128x128xf32> to vector<128x128xbf16>
    %cst_22 = arith.constant dense<0.000000e+00> : vector<128x32xf32>
    %31 = tpu.matmul %30, %8, %cst_22 {dimension_numbers = #tpu.dot_dimension_numbers<[1], [1], [0], [0], [0, 0, 1, 0], [], []>} : vector<128x128xbf16>, vector<32x128xbf16>, vector<128x32xf32> -> vector<128x32xf32>
    %c0_23 = arith.constant 0 : index
    %c0_24 = arith.constant 0 : index
    %32 = vector.load %arg12[%c0_23, %c0_24] : memref<128x32xf32, #tpu.memory_space<vmem>>, vector<128x32xf32>
    %33 = vector.broadcast %19 : vector<128x1xf32> to vector<128x32xf32>
    %34 = arith.mulf %33, %32 : vector<128x32xf32>
    %35 = arith.addf %34, %31 : vector<128x32xf32>
    %c0_25 = arith.constant 0 : index
    %c0_26 = arith.constant 0 : index
    %36 = vector.load %arg12[%c0_25, %c0_26] : memref<128x32xf32, #tpu.memory_space<vmem>>, vector<128x32xf32>
    tpu.vector_store %arg12[%c0_25, %c0_26], %35 {strides = array<i32>} : memref<128x32xf32, #tpu.memory_space<vmem>>, vector<128x32xf32>,
    %c1_i32 = arith.constant 1 : i32
    %37 = arith.cmpi eq, %arg2, %c1_i32 : i32
    %38 = arith.extui %37 : i1 to i32
    %c0_i32_27 = arith.constant 0 : i32
    %39 = arith.cmpi ne, %38, %c0_i32_27 : i32
    scf.if %39 {
      %c0_28 = arith.constant 0 : index
      %c0_29 = arith.constant 0 : index
      %40 = vector.load %arg12[%c0_28, %c0_29] : memref<128x32xf32, #tpu.memory_space<vmem>>, vector<128x32xf32>
      %c0_30 = arith.constant 0 : index
      %c0_31 = arith.constant 0 : index
      %41 = vector.load %arg11[%c0_30, %c0_31] : memref<128x1xf32, #tpu.memory_space<vmem>>, vector<128x1xf32>
      %42 = tpu.reciprocal %41 {approx = true} : vector<128x1xf32> -> vector<128x1xf32>
      %43 = vector.broadcast %42 : vector<128x1xf32> to vector<128x32xf32>
      %44 = arith.mulf %40, %43 : vector<128x32xf32>
      %c0_32 = arith.constant 0 : index
      %c0_33 = arith.constant 0 : index
      %45 = vector.load %arg7[%c0_32, %c0_33] : memref<4x32xf32, #tpu.memory_space<vmem>>, vector<4x32xf32>
      %cst_34 = arith.constant dense<0.000000e+00> : vector<4x128xf32>
      %46 = tpu.matmul %45, %44, %cst_34 {dimension_numbers = #tpu.dot_dimension_numbers<[1], [1], [0], [0], [0, 0, 1, 0], [], []>} : vector<4x32xf32>, vector<128x32xf32>, vector<4x128xf32> -> vector<4x128xf32>
      %c0_35 = arith.constant 0 : index
      %c0_36 = arith.constant 0 : index
      %47 = vector.load %arg8[%c0_35, %c0_36] : memref<4x1xf32, #tpu.memory_space<vmem>>, vector<4x1xf32>
      %48 = vector.broadcast %47 : vector<4x1xf32> to vector<4x128xf32>
      %49 = arith.addf %46, %48 : vector<4x128xf32>
      %c0_37 = arith.constant 0 : index
      %c0_38 = arith.constant 0 : index
      %c0_39 = arith.constant 0 : index
      %50 = vector.load %arg9[%c0_37, %c0_38, %c0_39] : memref<1x4x128xf32, #tpu.memory_space<vmem>>, vector<1x4x128xf32>
      %51 = vector.shape_cast %50 : vector<1x4x128xf32> to vector<4x128xf32>
      %52 = vector.shape_cast %49 : vector<4x128xf32> to vector<1x4x128xf32>
      tpu.vector_store %arg9[%c0_37, %c0_38, %c0_39], %52 {strides = array<i32>} : memref<1x4x128xf32, #tpu.memory_space<vmem>>, vector<1x4x128xf32>,
    } else {
    }
    return
  }
  func.func @transform_0(%arg0: i32, %arg1: i32, %arg2: i32) -> (i32, i32, i32) {
    %c0_i32 = arith.constant 0 : i32
    %c0_i32_0 = arith.constant 0 : i32
    return %arg0, %c0_i32, %arg1 : i32, i32, i32
  }
  func.func @transform_1(%arg0: i32, %arg1: i32, %arg2: i32) -> (i32, i32, i32) {
    %c0_i32 = arith.constant 0 : i32
    %c0_i32_0 = arith.constant 0 : i32
    return %arg0, %c0_i32, %arg2 : i32, i32, i32
  }
  func.func @transform_2(%arg0: i32, %arg1: i32, %arg2: i32) -> (i32, i32, i32) {
    %c0_i32 = arith.constant 0 : i32
    %c0_i32_0 = arith.constant 0 : i32
    return %arg0, %c0_i32, %arg2 : i32, i32, i32
  }
  func.func @transform_3(%arg0: i32, %arg1: i32, %arg2: i32) -> (i32, i32, i32) {
    %c0_i32 = arith.constant 0 : i32
    %c0_i32_0 = arith.constant 0 : i32
    return %arg0, %c0_i32, %arg2 : i32, i32, i32
  }
  func.func @transform_4(%arg0: i32, %arg1: i32, %arg2: i32) -> (i32, i32) {
    %c0_i32 = arith.constant 0 : i32
    %c0_i32_0 = arith.constant 0 : i32
    %c0_i32_1 = arith.constant 0 : i32
    return %c0_i32, %c0_i32_0 : i32, i32
  }
  func.func @transform_5(%arg0: i32, %arg1: i32, %arg2: i32) -> (i32, i32) {
    %c0_i32 = arith.constant 0 : i32
    %c0_i32_0 = arith.constant 0 : i32
    %c0_i32_1 = arith.constant 0 : i32
    return %c0_i32, %c0_i32_0 : i32, i32
  }
  func.func @transform_6(%arg0: i32, %arg1: i32, %arg2: i32) -> (i32, i32, i32) {
    %c0_i32 = arith.constant 0 : i32
    %c0_i32_0 = arith.constant 0 : i32
    return %arg0, %c0_i32, %arg1 : i32, i32, i32
  }
}

</mosaic_0001>

<bundles_post_ra>
// kernel: tpu_custom_call.1
= control target key start
LH: loop header
LB: loop body
LE: loop exit
PB: predicated region body
PF: predicated region fallthrough
CT: control target
= control target key end

     0   :  { %s3293_s0 = inlined_call_operand.hbm [shape: bf16[2,32,256], index: 0, kind: input, shape index: {}]   ;;  %s3294_s1 = inlined_call_operand.hbm [shape: bf16[2,32,256], index: 1, kind: input, shape index: {}]   ;;  %s3295_s2 = inlined_call_operand.hbm [shape: bf16[2,32,256], index: 2, kind: input, shape index: {}]   ;;  %s3296_s3 = inlined_call_operand.vmem [shape: f32[2,1,256], index: 3, kind: input, shape index: {}]   ;;  %s3297_s4 = inlined_call_operand.vmem [shape: f32[4,32], index: 4, kind: input, shape index: {}]   ;;  %s3298_s5 = inlined_call_operand.vmem [shape: f32[4,1], index: 5, kind: input, shape index: {}]   ;;  %s3299_s6 = inlined_call_operand.hbm [shape: f32[2,4,256], index: 6, kind: output, shape index: {}]  }
   0x1   :  { %3331 = sst [smem:[#allocation29_spill]] %s3294_s1 }
   0x2   :  { %3332 = sst [smem:[#allocation30_spill]] %s3296_s3 }
   0x3   :  { %3333 = sst [smem:[#allocation31_spill]] %s3297_s4 }
   0x4   :  { %3334 = sst [smem:[#allocation32_spill]] %s3298_s5 }
   0x5   :  { %3335 = sst [smem:[#allocation33_spill]] %s3299_s6 }
   0x6   :  { %11 = vsyncpa [#allocation6], 0 }
   0x7   :  { %13 = vsyncpa [#allocation6 + $0x1], 0 }
   0x8   :  { %14 = vsyncpa [#allocation9], 0 }
   0x9   :  { %16 = vsyncpa [#allocation9 + $0x1], 0 }
   0xa   :  { %17 = vsyncpa [#allocation7], 0 }
   0xb   :  { %19 = vsyncpa [#allocation7 + $0x1], 0  ;;  %s2430_s21 = smov 0   ;;  %s2432_s22 = smov 0  }
   0xc   :  { %s2434_s23 = smov 0   ;;  %s2436_s24 = smov 0  }
   0xd   :  { %s2438_s25 = smov 0   ;;  %s2440_s26 = smov 0  }
   0xe   :  { %s2442_s27 = smov 0   ;;  %s2444_s28 = smov 0  }
   0xf   :  { %s2446_s29 = smov 0   ;;  %s2448_s30 = smov 0  }
  0x10   :  { %s2450_s7 = smov 0   ;;  %s2452_s8 = smov 0  }
  0x11   :  { %s2454_s9 = smov 0  }
  0x12 LB: > { %3336 = sst [smem:[#allocation15_spill]] %s2335_s22  ;;  %s2494_s10 = sadd.s32 4294967295, %s2379_s9   ;;  %s2379_s9 = sphi %s2454_s9, %s25_s9   ;;  %s2375_s8 = sphi %s2452_s8, %s3401_s8   ;;  %s2371_s7 = sphi %s2450_s7, %s3409_s7   ;;  %s2367_s30 = sphi %s2448_s30, %s3408_s30   ;;  %s2363_s29 = sphi %s2446_s29, %s3399_s29   ;;  %s2359_s28 = sphi %s2444_s28, %s3398_s28   ;;  %s2355_s27 = sphi %s2442_s27, %s3407_s27   ;;  %s2351_s26 = sphi %s2440_s26, %s3406_s26   ;;  %s2347_s25 = sphi %s2438_s25, %s3405_s25   ;;  %s2343_s24 = sphi %s2436_s24, %s3404_s24   ;;  %s2339_s23 = sphi %s2434_s23, %s3403_s23   ;;  %s2335_s22 = sphi %s2432_s22, %s3402_s22   ;;  %s2331_s21 = sphi %s2430_s21, %s3397_s21  }
  0x13   : > { %3337 = sst [smem:[#allocation16_spill]] %s2343_s24  ;;  %s37_s11 = sadd.s32 1, %s2367_s30 }
  0x14   : > { %3338 = sst [smem:[#allocation17_spill]] %s2355_s27  ;;  %p2497_p0 = scmp.ge.s32.totalorder %s37_s11, 2 }
  0x15   : > { %3339 = sst [smem:[#allocation18_spill]] %s2359_s28  ;;  %p3306_p1 = scmp.eq.s32.totalorder %s2379_s9, 0 }
  0x16   : > { %3340 = sst [smem:[#allocation19_spill]] %s2363_s29  ;;  %p3305_p2 = scmp.eq.s32.totalorder %s2494_s10, 0 }
  0x17   : > { %3341 = sst [smem:[#allocation20_spill]] %s2371_s7  ;;  %s3411_s11 = smov (%p2497_p0, %s37_s11), 0 }
  0x18   : > { %3342 = sst [smem:[#allocation21_spill]] %s2375_s8  ;;  %p88_p3 = scmp.ne.s32.totalorder %s2339_s23, %s2335_s22 }
  0x19   : > { %3343 = sst [smem:[#allocation22_spill]] %s2494_s10  ;;  %p94_p4 = scmp.ne.s32.totalorder %s2335_s22, %s2331_s21 }
  0x1a   : > { %p2516_p5 = por %p88_p3, %p3306_p1  ;;  %p3304_p7 = scmp.lt.s32.totalorder %s2379_s9, 8 }
  0x1b   : > { %p2522_p6 = por %p94_p4, %p3305_p2  ;;  %s3301_s18 = sshll.u32 %s2375_s8, 3 }
  0x1c   : > { %s272_s19 = sand.u32 1, %s2379_s9   ;;  %s274_s20 = sand.u32 1, %s2339_s23  }
  0x1d   : > { %s3346_s17 = scalar_select %p2522_p6, 1, 0 }
  0x1e   : > { %s1708_s14 = sshll.u32 %s274_s20, 4  ;;  %s281_s13 = sadd.s32 %s2367_s30, %s3301_s18 }
  0x1f   : > { %3347 = sst [smem:[#allocation23_spill]] %s3346_s17  ;;  %s1710_s15 = sshll.u32 %s281_s13, 6 }
  0x20   : > { %s276_s21 = scalar_lea.vmem [#allocation8], %s1708_s14  ;;  %s3348_s1 = sld [smem:[#allocation29_spill]] }
  0x21   : > { %s284_s6 = sshll.u32 %s276_s21, 4  ;;  %p2544_p8 = pnand %p3304_p7, %p2516_p5  ;;  %s2538_s6 = int_to_ptr.vmem [resolvable:$true] %s284_s6 }
  0x22   : > { %s2551_s4 = scalar_lea.hbm %s3295_s2, %s1710_s15  ;;  %s298_s28 = scalar_lea.vmem [#allocation10], %s1708_s14 }
  0x23   : > { %s306_s21 = sshll.u32 %s298_s28, 4  ;;  %s2555_s3 = scalar_lea.sflag [#allocation9], %s272_s19  ;;  %s2553_s21 = int_to_ptr.vmem [resolvable:$true] %s306_s21 }
  0x24   : > { %p2149_p10 = pneg %p2544_p8 }
  0x26   : > { %s2536_s5 = scalar_lea.hbm %s3348_s1, %s1710_s15  ;;  %s2152_s13 = scalar_lea.hbm %s3348_s1, 1024 }
  0x27   : > { %s2147_s16 = scalar_lea.hbm %s2536_s5, 256  ;;  %p2153_p13 = scmp.lt.u32.totalorder %s2536_s5, %s3348_s1 }
  0x28   : > { %p2148_p9 = scmp.ne.s32.totalorder %s2536_s5, %s2147_s16  ;;  %p2154_p3 = scmp.lt.u32.totalorder %s2152_s13, %s2147_s16 }
  0x29   : > { %p2156_p5 = scmp.lt.u32.totalorder %s2147_s16, %s2536_s5 }
  0x2a   : > { %p2150_p11 = pnand %p2149_p10, %p2148_p9  ;;  %p2155_p4 = por %p2154_p3, %p2153_p13 }
  0x2c   : > { %p2151_p12 = pneg %p2150_p11  ;;  %p2157_p7 = por %p2156_p5, %p2155_p4 }
  0x2e   : > { %p2158_p2 = pnand %p2157_p7, %p2151_p12 }
  0x30   : > { %2161 = shalt.err (!%p2158_p2)
}
  0x31   : > { %s2162_s14 = scalar_lea.vmem %s2538_s6, 256  ;;  %s2381_s27 = smov [#allocation8]  }
  0x32   : > { %p2163_p9 = scmp.ne.s32.totalorder %s2538_s6, %s2162_s14  ;;  %s2167_s19 = sshll.u32 %s2381_s27, 4  ;;  %s2168_s19 = int_to_ptr.vmem [resolvable:$false] %s2167_s19 }
  0x33   : > { %s2169_s29 = scalar_lea.vmem %s2168_s19, 512  ;;  %p2170_p6 = scmp.lt.s32.totalorder %s2538_s6, %s2168_s19 }
  0x34   : > { %p2165_p11 = pnand %p2163_p9, %p2149_p10  ;;  %p2171_p13 = scmp.lt.s32.totalorder %s2169_s29, %s2162_s14 }
  0x36   : > { %p2166_p1 = pneg %p2165_p11  ;;  %p2172_p3 = por %p2171_p13, %p2170_p6 }
  0x38   : > { %p2173_p4 = pnand %p2172_p3, %p2166_p1 }
  0x3a   : > { %2176 = shalt.err (!%p2173_p4)
}
  0x3b   : > { %s3308_s28 = smov 128   ;;  %s3310_s16 = smov 64  }
  0x3c   : > { %s3312_s18 = smov 4   ;;  %p1714_p1 = scmp.ge.s32.totalorder %s2379_s9, 1 }
  0x3d   : > { %1917 = dma.hbm_to_vmem [thread:$0]  (!%p2544_p8), %s2536_s5, 256, %s2538_s6, %s2555_s3, %s3308_s28, %s3310_s16, %s3312_s18  }
  0x3e   : > { %p324_p2 = scmp.lt.s32.totalorder %s2379_s9, 9  ;;  %s1702_s15 = sadd.s32 4294967294, %s2379_s9  }
  0x3f   : > { %s40_s14 = sadd.s32 1, %s2371_s7  ;;  %s53_s27 = sadd.s32 1, %s2351_s26 }
  0x40   : > { %p2588_p6 = pnand %p1714_p1, %p324_p2  ;;  %s3413_s14 = smov (!%p2497_p0, %s40_s14), %s2371_s7 }
  0x41   : > { %p60_p7 = scmp.ne.s32.totalorder %s2351_s26, %s2347_s25  ;;  %p66_p12 = scmp.ne.s32.totalorder %s2347_s25, %s2343_s24 }
  0x42   : > { %s3350_s13 = scalar_select %p2588_p6, 1, 0 }
  0x43   : > { %p42_p5 = scmp.ge.s32.totalorder %s3413_s14, 2  ;;  %p218_p9 = scmp.eq.s32.totalorder %s2494_s10, 7 }
  0x44   : > { %p3351_p11 = scmp.eq.s32.totalorder %s2379_s9, 0  ;;  %p3353_p3 = scmp.eq.s32.totalorder %s2494_s10, 0 }
  0x45   : > { %s3415_s14 = smov (%p42_p5, %s3413_s14), 0  ;;  %s3357_s12 = sadd.s32 1, %s2375_s8 }
  0x46   : > { %p2605_p13 = por %p3351_p11, %p60_p7  ;;  %p2614_p4 = por %p3353_p3, %p66_p12 }
  0x47   : > { %3356 = sst [smem:[#allocation25_spill]] %s3415_s14  ;;  %s3417_s12 = smov (!%p42_p5, %s3357_s12), %s2375_s8 }
  0x48   : > { %s3354_s6 = scalar_select %p2614_p4, 1, 0 }
  0x49   : > { %s49_s19 = ssub.s32 %s2371_s7, %s3415_s14  ;;  %p2625_p0 = por %p218_p9, %p60_p7 }
  0x4a   : > { %3355 = sst [smem:[#allocation24_spill]] %s3354_s6  ;;  %p46_p1 = scmp.ge.s32.totalorder %s3417_s12, 2 }
  0x4b   : > { %s3358_s29 = scalar_select %p2625_p0, 1, 0 }
  0x4c   : > { %p224_p2 = scmp.eq.s32.totalorder %s1702_s15, 7  ;;  %s3328_s28 = sand.u32 1, %s2351_s26  }
  0x4d   : > { %3359 = sst [smem:[#allocation26_spill]] %s3358_s29  ;;  %s3360_s16 = sshll.u32 %s2375_s8, 3 }
  0x4e   : > { %s259_s18 = sadd.s32 %s2371_s7, %s3360_s16  ;;  %s3419_s12 = smov (%p46_p1, %s3417_s12), 0 }
  0x4f   : > { %3361 = sst [smem:[#allocation27_spill]] %s3419_s12  ;;  %p2638_p5 = por %p224_p2, %p66_p12 }
  0x50   : > { %s48_s14 = ssub.s32 %s2375_s8, %s3419_s12  ;;  %s1705_s29 = sshll.u32 %s3328_s28, 4 }
  0x51   : > { %s3362_s1 = scalar_select %p2638_p5, 1, 0 }
  0x52   : > { %s50_s15 = sor.u32 %s49_s19, %s48_s14  ;;  %s3364_s17 = ssub.s32 %s2367_s30, %s3411_s11 }
  0x53   : > { %3363 = sst [smem:[#allocation28_spill]] %s3362_s1  ;;  %s78_s22 = sor.u32 %s3364_s17, %s48_s14 }
  0x54   : > { %p51_p7 = scmp.eq.s32.totalorder %s50_s15, 0  ;;  %p79_p9 = scmp.eq.s32.totalorder %s78_s22, 0 }
  0x55   : > { %s1707_s16 = sshll.u32 %s259_s18, 6  ;;  %s3365_s24 = sadd.s32 1, %s2339_s23 }
  0x56   : > { %s2650_s7 = scalar_select %p51_p7, %s2351_s26, %s53_s27  }
  0x57   : > { %s2655_s10 = scalar_select %p79_p9, %s2339_s23, %s3365_s24  }
  0x58   : > { %s2660_s12 = scalar_lea.hbm %s3293_s0, %s1707_s16  ;;  %s254_s8 = scalar_lea.vmem [#allocation5], %s1705_s29 }
  0x59   : > { %s262_s28 = sshll.u32 %s254_s8, 4  ;;  %p3366_p12 = scmp.lt.s32.totalorder %s2379_s9, 8  ;;  %s2662_s28 = int_to_ptr.vmem [resolvable:$true] %s262_s28 }
  0x5a   : > { %s2177_s17 = scalar_lea.hbm %s2551_s4, 256  ;;  %s2182_s18 = scalar_lea.hbm %s3295_s2, 1024 }
  0x5b   : > { %p2668_p11 = pnand %p3366_p12, %p2605_p13  ;;  %p2178_p3 = scmp.ne.s32.totalorder %s2551_s4, %s2177_s17 }
  0x5c   : > { %p2183_p7 = scmp.lt.u32.totalorder %s2551_s4, %s3295_s2  ;;  %p2184_p9 = scmp.lt.u32.totalorder %s2182_s18, %s2177_s17 }
  0x5d   : > { %p2180_p1 = pnand %p2178_p3, %p2149_p10  ;;  %p2186_p13 = scmp.lt.u32.totalorder %s2177_s17, %s2551_s4 }
  0x5e   : > { %p2185_p5 = por %p2184_p9, %p2183_p7 }
  0x5f   : > { %p2181_p2 = pneg %p2180_p1 }
  0x60   : > { %p2187_p12 = por %p2186_p13, %p2185_p5 }
  0x62   : > { %p2188_p0 = pnand %p2187_p12, %p2181_p2 }
  0x64   : > { %2191 = shalt.err (!%p2188_p0)
}
  0x65   : > { %s2192_s27 = scalar_lea.vmem %s2553_s21, 256  ;;  %s2385_s5 = smov [#allocation10]  }
  0x66   : > { %p2193_p3 = scmp.ne.s32.totalorder %s2553_s21, %s2192_s27  ;;  %s2197_s6 = sshll.u32 %s2385_s5, 4  ;;  %s2198_s6 = int_to_ptr.vmem [resolvable:$false] %s2197_s6 }
  0x67   : > { %s2199_s19 = scalar_lea.vmem %s2198_s6, 512  ;;  %p2200_p6 = scmp.lt.s32.totalorder %s2553_s21, %s2198_s6 }
  0x68   : > { %p2195_p1 = pnand %p2193_p3, %p2149_p10  ;;  %p2201_p7 = scmp.lt.s32.totalorder %s2199_s19, %s2192_s27 }
  0x6a   : > { %p2196_p4 = pneg %p2195_p1  ;;  %p2202_p9 = por %p2201_p7, %p2200_p6 }
  0x6c   : > { %p2203_p5 = pnand %p2202_p9, %p2196_p4 }
  0x6e   : > { %2206 = shalt.err (!%p2203_p5)
}
  0x6f   : > { %s3368_s29 = smov 4   ;;  %s3369_s15 = smov 64  }
  0x70   : > { %s3370_s16 = smov 128   ;;  %s3371_s17 = sand.u32 1, %s2351_s26  }
  0x71   : > { %1920 = dma.hbm_to_vmem [thread:$0]  (!%p2544_p8), %s2551_s4, 256, %s2553_s21, %s2555_s3, %s3370_s16, %s3369_s15, %s3368_s29  }
  0x72   : > { %s2701_s24 = scalar_lea.sflag [#allocation6], %s3371_s17  ;;  %s2207_s1 = scalar_lea.hbm %s2660_s12, 256 }
  0x73   : > { %p2208_p10 = scmp.ne.s32.totalorder %s2660_s12, %s2207_s1  ;;  %p2209_p6 = pneg %p2668_p11 }
  0x74   : > { %s2212_s14 = scalar_lea.hbm %s3293_s0, 1024  ;;  %p2213_p2 = scmp.lt.u32.totalorder %s2660_s12, %s3293_s0 }
  0x75   : > { %p2210_p4 = pnand %p2209_p6, %p2208_p10  ;;  %p2214_p8 = scmp.lt.u32.totalorder %s2212_s14, %s2207_s1 }
  0x76   : > { %p2216_p12 = scmp.lt.u32.totalorder %s2207_s1, %s2660_s12 }
  0x77   : > { %p2211_p0 = pneg %p2210_p4  ;;  %p2215_p13 = por %p2214_p8, %p2213_p2 }
  0x79   : > { %p2217_p3 = por %p2216_p12, %p2215_p13 }
  0x7b   : > { %p2218_p1 = pnand %p2217_p3, %p2211_p0 }
  0x7d   : > { %2221 = shalt.err (!%p2218_p1)
}
  0x7e   : > { %s2222_s3 = scalar_lea.vmem %s2662_s28, 256  ;;  %s2386_s4 = smov [#allocation5]  }
  0x7f   : > { %p2223_p7 = scmp.ne.s32.totalorder %s2662_s28, %s2222_s3  ;;  %s2227_s21 = sshll.u32 %s2386_s4, 4  ;;  %s2228_s21 = int_to_ptr.vmem [resolvable:$false] %s2227_s21 }
  0x80   : > { %s2229_s5 = scalar_lea.vmem %s2228_s21, 512  ;;  %p2230_p10 = scmp.lt.s32.totalorder %s2662_s28, %s2228_s21 }
  0x81   : > { %p2225_p9 = pnand %p2223_p7, %p2209_p6  ;;  %p2231_p4 = scmp.lt.s32.totalorder %s2229_s5, %s2222_s3 }
  0x83   : > { %p2226_p5 = pneg %p2225_p9  ;;  %p2232_p2 = por %p2231_p4, %p2230_p10 }
  0x85   : > { %p2233_p8 = pnand %p2232_p2, %p2226_p5 }
  0x87   : > { %2236 = shalt.err (!%p2233_p8)
}
  0x88   : > { %1914 = dma.hbm_to_vmem [thread:$0]  (!%p2668_p11), %s2660_s12, 256, %s2662_s28, %s2701_s24, %s3370_s16, %s3369_s15, %s3368_s29  }
  0x89   : > { %p3372_p6 = scmp.ne.s32.totalorder %s3350_s13, 0 }
  0x8a   : > { %s3373_s6 = sld [smem:[#allocation24_spill]] (!%p3372_p6)  ;;  %s2735_s19 = sand.u32 (!%p3372_p6), 1, %s2347_s25  }
  0x8b   : > { %328 = sbr.rel (%p3372_p6) target bundleno = 1480 (0x5c8), region = 44  ;;  %s1715_s17 = sshll.u32 (!%p3372_p6), %s2735_s19, 4 }
  0x8c   : > { %s331_s1 = scalar_lea.sflag (!%p3372_p6), [#allocation6], %s2735_s19  ;;  %s2739_s20 = scalar_lea.vmem (!%p3372_p6), [#allocation5], %s1715_s17 }
  0x90   : > { %p3374_p0 = scmp.ne.s32.totalorder (!%p3372_p6), %s3373_s6, 0 }
  0x92   : > { %2318 = dma.done.wait (%p3374_p0), %s331_s1, 256  }
  0x93   : > { %2320 = vsyncadd (%p3374_p0), %s331_s1, 4294967040  ;;  %s3375_s22 = sld [smem:[#allocation22_spill]]  ;;  %s3376_s28 = sld [smem:[#allocation15_spill]] }
  0x94   : > { %s3377_s12 = sld [smem:[#allocation23_spill]] }
  0x99   : > { %s339_s13 = sand.u32 1, %s3375_s22   ;;  %s341_s29 = sand.u32 1, %s3376_s28  }
  0x9a   : > { %s2747_s15 = sshll.u32 %s341_s29, 4  ;;  %s340_s16 = scalar_lea.sflag [#allocation9], %s339_s13 }
  0x9b   : > { %s343_s24 = scalar_lea.vmem [#allocation8], %s2747_s15  ;;  %p3378_p11 = scmp.ne.s32.totalorder %s3377_s12, 0 }
  0x9d   : > { %2322 = dma.done.wait (%p3378_p11), %s340_s16, 512  }
  0x9e   : > { %2324 = vsyncadd (%p3378_p11), %s340_s16, 4294966784  ;;  %s3379_s18 = sld [smem:[#allocation19_spill]]  ;;  %s3380_s14 = sld [smem:[#allocation17_spill]] }
  0x9f   : > { %s1718_s8 = sshll.u32 %s2735_s19, 2  ;;  %s3381_s6 = sld [smem:[#allocation30_spill]] }
  0xa0   : > { %s352_s1 = scalar_lea.vmem [#allocation10], %s2747_s15  ;;  %s2766_s22 = scalar_lea.vmem [#allocation11], %s1718_s8 }
  0xa4   : > { %p398_p13 = scmp.lt.s32.totalorder %s3379_s18, 1  ;;  %p400_p12 = scmp.lt.s32.totalorder %s3380_s14, 1 }
  0xa5   : > { %p1720_p3 = scmp.ne.s32.totalorder %s3380_s14, 0 }
  0xa6   : > { %s3421_s18 = smov (!%p398_p13, %s3379_s18), 1  ;;  %vm410_vm0 = vcmask (!%p1720_p3), 7168   ;;  %vm443_vm1 = vcmask (!%p1720_p3), 261120   ;;  %v2387_v0 = vmov (!%p1720_p3), -inf   ;;  %v2388_v1 = vmov (!%p1720_p3), 0.0  }
  0xa7   : > { %s401_s27 = scalar_select %p400_p12, %s3380_s14, 1 }
  0xa8   : > { %s1719_s3 = sshll.u32 %s3421_s18, 1  ;;  %409 = sbr.rel (%p1720_p3) target bundleno = 192 (0xc0), region = 60  ;;  %411 = vst.msk [vmem:[#allocation2] sm:$0xff] (!%p1720_p3), %vm410_vm0, %v2387_v0  ;;  %412 = vst.msk [vmem:[#allocation2 + $0x8] sm:$0xff] (!%p1720_p3), %vm410_vm0, %v2387_v0 }
  0xa9   : > { %s2759_s4 = sadd.s32 %s1719_s3, %s401_s27  ;;  %413 = vst.msk [vmem:[#allocation2 + $0x10] sm:$0xff] (!%p1720_p3), %vm410_vm0, %v2387_v0  ;;  %414 = vst.msk [vmem:[#allocation2 + $0x18] sm:$0xff] (!%p1720_p3), %vm410_vm0, %v2387_v0 }
  0xaa   : > { %s404_s17 = scalar_lea.vmem %s3381_s6, %s2759_s4  ;;  %415 = vst.msk [vmem:[#allocation2 + $0x20] sm:$0xff] (!%p1720_p3), %vm410_vm0, %v2387_v0  ;;  %416 = vst.msk [vmem:[#allocation2 + $0x28] sm:$0xff] (!%p1720_p3), %vm410_vm0, %v2387_v0 }
  0xab   : > { %417 = vst.msk [vmem:[#allocation2 + $0x30] sm:$0xff] (!%p1720_p3), %vm410_vm0, %v2387_v0  ;;  %418 = vst.msk [vmem:[#allocation2 + $0x38] sm:$0xff] (!%p1720_p3), %vm410_vm0, %v2387_v0 }
  0xac   : > { %419 = vst.msk [vmem:[#allocation2 + $0x40] sm:$0xff] (!%p1720_p3), %vm410_vm0, %v2387_v0  ;;  %420 = vst.msk [vmem:[#allocation2 + $0x48] sm:$0xff] (!%p1720_p3), %vm410_vm0, %v2387_v0 }
  0xad   : > { %421 = vst.msk [vmem:[#allocation2 + $0x50] sm:$0xff] (!%p1720_p3), %vm410_vm0, %v2387_v0  ;;  %422 = vst.msk [vmem:[#allocation2 + $0x58] sm:$0xff] (!%p1720_p3), %vm410_vm0, %v2387_v0 }
  0xae   : > { %423 = vst.msk [vmem:[#allocation2 + $0x60] sm:$0xff] (!%p1720_p3), %vm410_vm0, %v2387_v0  ;;  %424 = vst.msk [vmem:[#allocation2 + $0x68] sm:$0xff] (!%p1720_p3), %vm410_vm0, %v2387_v0 }
  0xaf   : > { %425 = vst.msk [vmem:[#allocation2 + $0x70] sm:$0xff] %vm410_vm0, %v2387_v0  ;;  %426 = vst.msk [vmem:[#allocation2 + $0x78] sm:$0xff] %vm410_vm0, %v2387_v0 }
  0xb0   : > { %427 = vst.msk [vmem:[#allocation3] sm:$0xff] %vm410_vm0, %v2388_v1  ;;  %428 = vst.msk [vmem:[#allocation3 + $0x8] sm:$0xff] %vm410_vm0, %v2388_v1 }
  0xb1   : > { %429 = vst.msk [vmem:[#allocation3 + $0x10] sm:$0xff] %vm410_vm0, %v2388_v1  ;;  %430 = vst.msk [vmem:[#allocation3 + $0x18] sm:$0xff] %vm410_vm0, %v2388_v1 }
  0xb2   : > { %431 = vst.msk [vmem:[#allocation3 + $0x20] sm:$0xff] %vm410_vm0, %v2388_v1  ;;  %432 = vst.msk [vmem:[#allocation3 + $0x28] sm:$0xff] %vm410_vm0, %v2388_v1 }
  0xb3   : > { %433 = vst.msk [vmem:[#allocation3 + $0x30] sm:$0xff] %vm410_vm0, %v2388_v1  ;;  %434 = vst.msk [vmem:[#allocation3 + $0x38] sm:$0xff] %vm410_vm0, %v2388_v1 }
  0xb4   : > { %435 = vst.msk [vmem:[#allocation3 + $0x40] sm:$0xff] %vm410_vm0, %v2388_v1  ;;  %436 = vst.msk [vmem:[#allocation3 + $0x48] sm:$0xff] %vm410_vm0, %v2388_v1 }
  0xb5   : > { %437 = vst.msk [vmem:[#allocation3 + $0x50] sm:$0xff] %vm410_vm0, %v2388_v1  ;;  %438 = vst.msk [vmem:[#allocation3 + $0x58] sm:$0xff] %vm410_vm0, %v2388_v1 }
  0xb6   : > { %439 = vst.msk [vmem:[#allocation3 + $0x60] sm:$0xff] %vm410_vm0, %v2388_v1  ;;  %440 = vst.msk [vmem:[#allocation3 + $0x68] sm:$0xff] %vm410_vm0, %v2388_v1 }
  0xb7   : > { %441 = vst.msk [vmem:[#allocation3 + $0x70] sm:$0xff] %vm410_vm0, %v2388_v1  ;;  %442 = vst.msk [vmem:[#allocation3 + $0x78] sm:$0xff] %vm410_vm0, %v2388_v1 }
  0xb8   : > { %444 = vst.msk [vmem:[#allocation4] sm:$0xff] %vm443_vm1, %v2388_v1  ;;  %445 = vst.msk [vmem:[#allocation4 + $0x8] sm:$0xff] %vm443_vm1, %v2388_v1 }
  0xb9   : > { %446 = vst.msk [vmem:[#allocation4 + $0x10] sm:$0xff] %vm443_vm1, %v2388_v1  ;;  %447 = vst.msk [vmem:[#allocation4 + $0x18] sm:$0xff] %vm443_vm1, %v2388_v1 }
  0xba   : > { %448 = vst.msk [vmem:[#allocation4 + $0x20] sm:$0xff] %vm443_vm1, %v2388_v1  ;;  %449 = vst.msk [vmem:[#allocation4 + $0x28] sm:$0xff] %vm443_vm1, %v2388_v1 }
  0xbb   : > { %450 = vst.msk [vmem:[#allocation4 + $0x30] sm:$0xff] %vm443_vm1, %v2388_v1  ;;  %451 = vst.msk [vmem:[#allocation4 + $0x38] sm:$0xff] %vm443_vm1, %v2388_v1 }
  0xbc   : > { %452 = vst.msk [vmem:[#allocation4 + $0x40] sm:$0xff] %vm443_vm1, %v2388_v1  ;;  %453 = vst.msk [vmem:[#allocation4 + $0x48] sm:$0xff] %vm443_vm1, %v2388_v1 }
  0xbd   : > { %454 = vst.msk [vmem:[#allocation4 + $0x50] sm:$0xff] %vm443_vm1, %v2388_v1  ;;  %455 = vst.msk [vmem:[#allocation4 + $0x58] sm:$0xff] %vm443_vm1, %v2388_v1 }
  0xbe   : > { %456 = vst.msk [vmem:[#allocation4 + $0x60] sm:$0xff] %vm443_vm1, %v2388_v1  ;;  %457 = vst.msk [vmem:[#allocation4 + $0x68] sm:$0xff] %vm443_vm1, %v2388_v1 }
  0xbf   : > { %458 = vst.msk [vmem:[#allocation4 + $0x70] sm:$0xff] %vm443_vm1, %v2388_v1  ;;  %459 = vst.msk [vmem:[#allocation4 + $0x78] sm:$0xff] %vm443_vm1, %v2388_v1 }
  0xc0 PF: > { %v2043_v2 = vld [vmem:[%s2739_s20] sm:$0xff]   ;;  %v2044_v3 = vld [vmem:[%s2739_s20 + $0x8] sm:$0xff]   ;;  %vm519_vm2 = vcmask 261120   ;;  %v2389_v33 = vmov 0   ;;  %vm961_vm3 = vcmask 7168   ;;  %s3383_s13 = sld [smem:[#allocation17_spill]] }
  0xc1   : > { %491 = vxpose.xlu0.c.b16.start [1/2] (short) %v2043_v2, 128  ;;  %v2045_v4 = vld [vmem:[%s343_s24] sm:$0xff]   ;;  %v2046_v5 = vld [vmem:[%s343_s24 + $0x8] sm:$0xff]   ;;  %2041 = vset.pattern.permute.xlu1 %v2389_v33 }
  0xc2   : > { %1796 = vmatprep.subr.bf16.mxu0 %v2045_v4  ;;  %v1721_v14 = vld [vmem:[%s404_s17] ss:$0 sm:$0xff]  ;;  %v2884_v48 = vld [vmem:[#allocation2 + $0x10] sm:$0xff]  ;;  %v2896_v54 = vld [vmem:[#allocation2 + $0x18] sm:$0xff] }
  0xc3   : > { %1797 = vmatpush3.bf16.msra.mxu0 %v2045_v4  ;;  %v2886_v49 = vld [vmem:[#allocation2] sm:$0xff]  ;;  %v2904_v57 = vld [vmem:[#allocation2 + $0x8] sm:$0xff]  ;;  %v2912_v60 = vld [vmem:[#allocation2 + $0x30] sm:$0xff] }
  0xc4   : > { %1798 = vmatprep.subr.bf16.mxu0 %v2046_v5  ;;  %v2047_v62 = vld [vmem:[%s352_s1] sm:$0xff]  }
  0xc5   : > { %492 = vxpose.xlu0.c.b16.end [2/2] (short) %v2044_v3, 128  ;;  %v2923_v0 = vld [vmem:[#allocation2 + $0x20] sm:$0xff]  ;;  %1816 = vmatprep.subr.bf16.mxu1 %v2047_v62  ;;  %v2931_v3 = vld [vmem:[#allocation2 + $0x38] sm:$0xff] }
  0xc6   : > { %1817 = vmatpush3.bf16.xpose.msra.mxu1 %v2047_v62  ;;  %p1736_p1 = scmp.ne.s32.totalorder %s3383_s13, 1 }
  0xc7   : > { %1799 = vmatpush3.bf16.msra.mxu0 %v2046_v5  ;;  %v2048_v5 = vld [vmem:[%s352_s1 + $0x8] sm:$0xff]   ;;  %s3384_s16 = sld [smem:[#allocation32_spill]] (!%p1736_p1)  ;;  %vm2392_vm4 = vmmov (!%p1736_p1), 0   ;;  %vm3187_vm5 = vmpackc.low (!%p1736_p1), %vm519_vm2, %vm519_vm2  ;;  %s3387_s14 = sld [smem:[#allocation31_spill]] (!%p1736_p1) }
  0xc8   : > { %1818 = vmatprep.subr.bf16.mxu1 %v2048_v5 }
  0xce   : > { %2042 = vset.pattern.permute.xlu0 %v2389_v33  ;;  %1819 = vmatpush3.bf16.xpose.msra.mxu1 %v2048_v5 }
 0x127   : > { %v499_v6 = vpop.trf.xlu0 }
 0x128   : > { %1800 = vmatprep.mubr.msk.bf16.mxu0 %vm519_vm2, %v499_v6 }
 0x12b   : > { %v500_v7 = vpop.trf.xlu0 }
 0x12c   : > { %1801 = vmatmul.mubr.msk.bf16.vlgmr.msra.gmra.mrb[0].mxu0 %vm519_vm2, %v500_v7  ;;  %v2941_v7 = vld [vmem:[#allocation2 + $0x28] sm:$0xff] }
 0x12f   : > { %v501_v8 = vpop.trf.xlu0 }
 0x130   : > { %1804 = vmatprep.mubr.msk.bf16.mxu0 %vm519_vm2, %v501_v8 }
 0x133   : > { %v502_v9 = vpop.trf.xlu0 }
 0x134   : > { %1805 = vmatmul.mubr.msk.bf16.gmra.mrb[4].mxu0 %vm519_vm2, %v502_v9  ;;  %v2945_v9 = vld [vmem:[#allocation2 + $0x68] sm:$0xff] }
 0x137   : > { %v503_v10 = vpop.trf.xlu0 }
 0x138   : > { %1808 = vmatprep.mubr.msk.bf16.mxu0 %vm519_vm2, %v503_v10 }
 0x13b   : > { %v504_v11 = vpop.trf.xlu0 }
 0x13c   : > { %1809 = vmatmul.mubr.msk.bf16.gmra.mrb[8].mxu0 %vm519_vm2, %v504_v11  ;;  %v2948_v11 = vld [vmem:[#allocation2 + $0x50] sm:$0xff] }
 0x13f   : > { %v505_v12 = vpop.trf.xlu0 }
 0x140   : > { %1812 = vmatprep.mubr.msk.bf16.mxu0 %vm519_vm2, %v505_v12 }
 0x143   : > { %v506_v13 = vpop.trf.xlu0 }
 0x144   : > { %1813 = vmatmul.mubr.msk.bf16.gmra.mrb[12].mxu0 %vm519_vm2, %v506_v13 }
 0x1ff   : > { %v1802_v15 = vpop.f32.mrb[0].mxu0 }
 0x200   : > { %v2836_v16 = vadd.f32 %v1802_v15, %v1721_v14  ;;  %v578_v17 = vpop.f32.mrb[1].mxu0  ;;  %v2954_v15 = vld [vmem:[#allocation2 + $0x78] sm:$0xff] }
 0x201   : > { %v2838_v18 = vadd.f32 %v1721_v14, %v578_v17  ;;  %v1803_v19 = vpop.f32.mrb[2].mxu0 }
 0x202   : > { %661 = vmax.xlane.f32.xlu0 %v2836_v16  ;;  %v581_v20 = vpop.f32.mrb[3].mxu0  ;;  %v2842_v21 = vadd.f32 %v1803_v19, %v1721_v14  ;;  %v2961_v19 = vld [vmem:[#allocation2 + $0x40] sm:$0xff] }
 0x203   : > { %657 = vmax.xlane.f32.xlu1 %v2838_v18  ;;  %v2845_v24 = vadd.f32 %v1721_v14, %v581_v20 }
 0x207   : > { %663 = vmax.xlane.f32.xlu1 %v2842_v21  ;;  %v1806_v22 = vpop.f32.mrb[4].mxu0 }
 0x208   : > { %v594_v23 = vpop.f32.mrb[5].mxu0  ;;  %v2847_v27 = vadd.f32 %v1806_v22, %v1721_v14 }
 0x209   : > { %v1807_v25 = vpop.f32.mrb[6].mxu0  ;;  %v2851_v30 = vadd.f32 %v1721_v14, %v594_v23 }
 0x20a   : > { %v597_v26 = vpop.f32.mrb[7].mxu0  ;;  %v2854_v34 = vadd.f32 %v1807_v25, %v1721_v14 }
 0x20b   : > { %659 = vmax.xlane.f32.xlu1 %v2845_v24  ;;  %v2857_v37 = vadd.f32 %v1721_v14, %v597_v26 }
 0x20f   : > { %669 = vmax.xlane.f32.xlu1 %v2847_v27  ;;  %v1810_v28 = vpop.f32.mrb[8].mxu0 }
 0x210   : > { %v610_v29 = vpop.f32.mrb[9].mxu0  ;;  %v2859_v40 = vadd.f32 %v1810_v28, %v1721_v14  ;;  %v652_v28 = vld [vmem:[#allocation2 + $0x58] sm:$0xff] }
 0x211   : > { %v1811_v31 = vpop.f32.mrb[10].mxu0  ;;  %v2868_v43 = vadd.f32 %v1721_v14, %v610_v29 }
 0x212   : > { %v613_v32 = vpop.f32.mrb[11].mxu0  ;;  %v2872_v44 = vadd.f32 %v1811_v31, %v1721_v14 }
 0x213   : > { %665 = vmax.xlane.f32.xlu1 %v2851_v30  ;;  %v2875_v45 = vadd.f32 %v1721_v14, %v613_v32  ;;  %v2979_v32 = vld [vmem:[#allocation2 + $0x48] sm:$0xff] }
 0x217   : > { %671 = vmax.xlane.f32.xlu1 %v2854_v34  ;;  %v1814_v35 = vpop.f32.mrb[12].mxu0 }
 0x218   : > { %v626_v36 = vpop.f32.mrb[13].mxu0  ;;  %v2877_v46 = vadd.f32 %v1814_v35, %v1721_v14 }
 0x219   : > { %v1815_v38 = vpop.f32.mrb[14].mxu0  ;;  %v2881_v47 = vadd.f32 %v1721_v14, %v626_v36 }
 0x21a   : > { %v629_v39 = vpop.f32.mrb[15].mxu0  ;;  %v2864_v42 = vadd.f32 %v1815_v38, %v1721_v14 }
 0x21b   : > { %667 = vmax.xlane.f32.xlu1 %v2857_v37  ;;  %v2862_v41 = vadd.f32 %v1721_v14, %v629_v39  ;;  %v2988_v39 = vld [vmem:[#allocation2 + $0x70] sm:$0xff] }
 0x21d   : > { %683 = vmax.xlane.f32.xlu0 %v2862_v41 }
 0x21f   : > { %677 = vmax.xlane.f32.xlu1 %v2859_v40 }
 0x221   : > { %687 = vmax.xlane.f32.xlu0 %v2864_v42 }
 0x223   : > { %673 = vmax.xlane.f32.xlu1 %v2868_v43 }
 0x227   : > { %679 = vmax.xlane.f32.xlu1 %v2872_v44 }
 0x22b   : > { %675 = vmax.xlane.f32.xlu1 %v2875_v45 }
 0x22f   : > { %685 = vmax.xlane.f32.xlu1 %v2877_v46 }
 0x233   : > { %681 = vmax.xlane.f32.xlu1 %v2881_v47 }
 0x28f   : > { %v662_v50 = vpop.xlane.xlu0 %661 }
 0x290   : > { %v2889_v51 = vmax.f32 %v2884_v48, %v662_v50  ;;  %v658_v52 = vpop.xlane.xlu1 %657 }
 0x291   : > { %v2892_v53 = vmax.f32 %v2886_v49, %v658_v52 }
 0x292   : > { %980 = vst.msk [vmem:[#allocation2 + $0x10] sm:$0xff] %vm961_vm3, %v2889_v51  ;;  %v707_v50 = vsub.f32 %v2884_v48, %v2889_v51 }
 0x293   : > { %978 = vst.msk [vmem:[#allocation2] sm:$0xff] %vm961_vm3, %v2892_v53  ;;  %755 = vperm.xlu1 %2041, %v2892_v53   ;;  %v705_v33 = vsub.f32 %v2886_v49, %v2892_v53 }
 0x294   : > { %v664_v55 = vpop.xlane.xlu1 %663 }
 0x295   : > { %v2902_v56 = vmax.f32 %v2896_v54, %v664_v55  ;;  %v721_v52 = vmul.f32 1.442695, %v705_v33 }
 0x297   : > { %981 = vst.msk [vmem:[#allocation2 + $0x18] sm:$0xff] %vm961_vm3, %v2902_v56  ;;  %765 = vperm.xlu1 %2041, %v2889_v51   ;;  %v708_v49 = vsub.f32 %v2896_v54, %v2902_v56  ;;  %2049 = vpow2.f32 %v721_v52 }
 0x298   : > { %v660_v58 = vpop.xlane.xlu1 %659 }
 0x299   : > { %v2910_v59 = vmax.f32 %v2904_v57, %v660_v58  ;;  %v727_v51 = vmul.f32 1.442695, %v708_v49 }
 0x29b   : > { %979 = vst.msk [vmem:[#allocation2 + $0x8] sm:$0xff] %vm961_vm3, %v2910_v59  ;;  %760 = vperm.xlu0 %2042, %v2910_v59   ;;  %770 = vperm.xlu1 %2041, %v2902_v56   ;;  %v706_v35 = vsub.f32 %v2904_v57, %v2910_v59  ;;  %v653_v57 = vld [vmem:[#allocation2 + $0x60] sm:$0xff]  ;;  %v725_v59 = vmul.f32 1.442695, %v707_v50 }
 0x29c   : > { %v670_v61 = vpop.xlane.xlu1 %669 }
 0x29d   : > { %v2921_v63 = vmax.f32 %v2912_v60, %v670_v61  ;;  %v723_v53 = vmul.f32 1.442695, %v706_v35 }
 0x29f   : > { %984 = vst.msk [vmem:[#allocation2 + $0x30] sm:$0xff] %vm961_vm3, %v2921_v63  ;;  %785 = vperm.xlu1 %2041, %v2921_v63   ;;  %2051 = vpow2.f32 %v723_v53 }
 0x2a0   : > { %v666_v1 = vpop.xlane.xlu1 %665  ;;  %2053 = vpow2.f32 %v725_v59 }
 0x2a1   : > { %v2929_v2 = vmax.f32 %v2923_v0, %v666_v1  ;;  %v711_v1 = vsub.f32 %v2912_v60, %v2921_v63  ;;  %2055 = vpow2.f32 %v727_v51 }
 0x2a3   : > { %982 = vst.msk [vmem:[#allocation2 + $0x20] sm:$0xff] %vm961_vm3, %v2929_v2  ;;  %775 = vperm.xlu1 %2041, %v2929_v2   ;;  %v709_v61 = vsub.f32 %v2923_v0, %v2929_v2  ;;  %v733_v5 = vmul.f32 1.442695, %v711_v1 }
 0x2a4   : > { %v672_v4 = vpop.xlane.xlu1 %671 }
 0x2a5   : > { %v2939_v6 = vmax.f32 %v2931_v3, %v672_v4  ;;  %v729_v4 = vmul.f32 1.442695, %v709_v61 }
 0x2a7   : > { %985 = vst.msk [vmem:[#allocation2 + $0x38] sm:$0xff] %vm961_vm3, %v2939_v6  ;;  %v712_v0 = vsub.f32 %v2931_v3, %v2939_v6  ;;  %2057 = vpow2.f32 %v729_v4 }
 0x2a8   : > { %v668_v8 = vpop.xlane.xlu1 %667 }
 0x2a9   : > { %v694_v10 = vmax.f32 %v2941_v7, %v668_v8  ;;  %v735_v60 = vmul.f32 1.442695, %v712_v0  ;;  %v3015_v8 = vpop.eup %2049 }
 0x2aa   : > { %v684_v12 = vpop.xlane.xlu0 %683 }
 0x2ab   : > { %983 = vst.msk [vmem:[#allocation2 + $0x28] sm:$0xff] %vm961_vm3, %v694_v10  ;;  %780 = vperm.xlu1 %2041, %v694_v10   ;;  %v2952_v13 = vmax.f32 %v2945_v9, %v684_v12  ;;  %v710_v54 = vsub.f32 %v2941_v7, %v694_v10  ;;  %v3017_v10 = vpop.eup %2051 }
 0x2ac   : > { %v678_v14 = vpop.xlane.xlu1 %677 }
 0x2ad   : > { %v2957_v17 = vmax.f32 %v2948_v11, %v678_v14  ;;  %991 = vst.msk [vmem:[#allocation2 + $0x68] sm:$0xff] %vm961_vm3, %v2952_v13  ;;  %v731_v2 = vmul.f32 1.442695, %v710_v54  ;;  %v3024_v14 = vpop.eup %2053 }
 0x2ae   : > { %v688_v20 = vpop.xlane.xlu0 %687 }
 0x2af   : > { %988 = vst.msk [vmem:[#allocation2 + $0x50] sm:$0xff] %vm961_vm3, %v2957_v17  ;;  %790 = vperm.xlu1 %2041, %v2939_v6   ;;  %v2967_v22 = vmax.f32 %v2954_v15, %v688_v20  ;;  %v715_v7 = vsub.f32 %v2948_v11, %v2957_v17  ;;  %2059 = vpow2.f32 %v731_v2 }
 0x2b0   : > { %v674_v23 = vpop.xlane.xlu1 %673  ;;  %2061 = vpow2.f32 %v733_v5 }
 0x2b1   : > { %v2970_v25 = vmax.f32 %v2961_v19, %v674_v23  ;;  %v720_v26 = vsub.f32 %v2954_v15, %v2967_v22  ;;  %993 = vst.msk [vmem:[#allocation2 + $0x78] sm:$0xff] %vm961_vm3, %v2967_v22  ;;  %v741_v12 = vmul.f32 1.442695, %v715_v7  ;;  %2063 = vpow2.f32 %v735_v60 }
 0x2b2   : > { %v718_v23 = vsub.f32 %v2945_v9, %v2952_v13 }
 0x2b3   : > { %986 = vst.msk [vmem:[#allocation2 + $0x40] sm:$0xff] %vm961_vm3, %v2970_v25  ;;  %795 = vperm.xlu1 %2041, %v2970_v25   ;;  %v713_v3 = vsub.f32 %v2961_v19, %v2970_v25  ;;  %2065 = vpow2.f32 %v741_v12 }
 0x2b4   : > { %v680_v29 = vpop.xlane.xlu1 %679 }
 0x2b5   : > { %v700_v31 = vmax.f32 %v652_v28, %v680_v29  ;;  %v737_v20 = vmul.f32 1.442695, %v713_v3 }
 0x2b7   : > { %989 = vst.msk [vmem:[#allocation2 + $0x58] sm:$0xff] %vm961_vm3, %v700_v31  ;;  %805 = vperm.xlu1 %2041, %v2957_v17   ;;  %v716_v63 = vsub.f32 %v652_v28, %v700_v31  ;;  %v3026_v17 = vpop.eup %2055 }
 0x2b8   : > { %v676_v36 = vpop.xlane.xlu1 %675  ;;  %v3032_v28 = vpop.eup %2057 }
 0x2b9   : > { %v698_v38 = vmax.f32 %v2979_v32, %v676_v36  ;;  %v743_v6 = vmul.f32 1.442695, %v716_v63  ;;  %v3034_v29 = vpop.eup %2059 }
 0x2ba   : > { %v3038_v9 = vpop.eup %2061 }
 0x2bb   : > { %987 = vst.msk [vmem:[#allocation2 + $0x48] sm:$0xff] %vm961_vm3, %v698_v38  ;;  %800 = vperm.xlu0 %2042, %v698_v38   ;;  %v714_v11 = vsub.f32 %v2979_v32, %v698_v38  ;;  %2067 = vpow2.f32 %v743_v6 }
 0x2bc   : > { %v686_v55 = vpop.xlane.xlu1 %685  ;;  %2069 = vpow2.f32 %v737_v20 }
 0x2bd   : > { %v2996_v58 = vmax.f32 %v2988_v39, %v686_v55  ;;  %v739_v19 = vmul.f32 1.442695, %v714_v11 }
 0x2bf   : > { %v719_v48 = vsub.f32 %v2988_v39, %v2996_v58  ;;  %992 = vst.msk [vmem:[#allocation2 + $0x70] sm:$0xff] %vm961_vm3, %v2996_v58  ;;  %810 = vperm.xlu0 %2042, %v700_v31   ;;  %v747_v31 = vmul.f32 1.442695, %v718_v23  ;;  %2071 = vpow2.f32 %v739_v19 }
 0x2c0   : > { %v682_v56 = vpop.xlane.xlu1 %681 }
 0x2c1   : > { %v701_v62 = vmax.f32 %v653_v57, %v682_v56  ;;  %2073 = vpow2.f32 %v747_v31 }
 0x2c3   : > { %990 = vst.msk [vmem:[#allocation2 + $0x60] sm:$0xff] %vm961_vm3, %v701_v62  ;;  %815 = vperm.xlu1 %2041, %v701_v62   ;;  %820 = vperm.xlu0 %2042, %v2952_v13   ;;  %v717_v25 = vsub.f32 %v653_v57, %v701_v62  ;;  %v3040_v13 = vpop.eup %2063 }
 0x2c4   : > { %v3044_v33 = vpop.eup %2065 }
 0x2c5   : > { %v745_v32 = vmul.f32 1.442695, %v717_v25  ;;  %v3046_v35 = vpop.eup %2067 }
 0x2c6   : > { %v3050_v36 = vpop.eup %2069 }
 0x2c7   : > { %825 = vperm.xlu1 %2041, %v2996_v58   ;;  %830 = vperm.xlu0 %2042, %v2967_v22   ;;  %2075 = vpow2.f32 %v745_v32 }
 0x2c9   : > { %v3052_v38 = vpop.eup %2071 }
 0x2cb   : > { %1134 = vperm.xlu1 %2041, %v3017_v10   ;;  %1129 = vperm.xlu0 %2042, %v3015_v8   ;;  %v3056_v50 = vpop.eup %2073 }
 0x2cf   : > { %1139 = vperm.xlu1 %2041, %v3024_v14   ;;  %1144 = vperm.xlu0 %2042, %v3026_v17  }
 0x2d1   : > { %v3058_v52 = vpop.eup %2075 }
 0x2d3   : > { %1149 = vperm.xlu1 %2041, %v3032_v28   ;;  %1154 = vperm.xlu0 %2042, %v3034_v29  }
 0x2d7   : > { %1159 = vperm.xlu1 %2041, %v3038_v9   ;;  %1164 = vperm.xlu0 %2042, %v3040_v13  }
 0x2db   : > { %1179 = vperm.xlu1 %2041, %v3044_v33   ;;  %1184 = vperm.xlu0 %2042, %v3046_v35  }
 0x2df   : > { %1169 = vperm.xlu1 %2041, %v3050_v36   ;;  %1174 = vperm.xlu0 %2042, %v3052_v38  }
 0x2e3   : > { %1189 = vperm.xlu1 %2041, %v3058_v52   ;;  %1194 = vperm.xlu0 %2042, %v3056_v50  }
 0x312   : > { %v756_v49 = vpop.permute.xlu1 %755 }
 0x313   : > { %v833_v53 = vsub.f32 %v2838_v18, %v756_v49 }
 0x315   : > { %v849_v55 = vmul.f32 1.442695, %v833_v53 }
 0x316   : > { %v766_v57 = vpop.permute.xlu1 %765 }
 0x317   : > { %2077 = vpow2.f32 %v849_v55  ;;  %v835_v59 = vsub.f32 %v2836_v16, %v766_v57 }
 0x319   : > { %v853_v61 = vmul.f32 1.442695, %v835_v59 }
 0x31a   : > { %v771_v51 = vpop.permute.xlu1 %770  ;;  %v761_v54 = vpop.permute.xlu0 %760 }
 0x31b   : > { %2079 = vpow2.f32 %v853_v61  ;;  %v836_v56 = vsub.f32 %v2842_v21, %v771_v51  ;;  %v834_v62 = vsub.f32 %v2845_v24, %v761_v54 }
 0x31d   : > { %v855_v1 = vmul.f32 1.442695, %v836_v56  ;;  %v851_v4 = vmul.f32 1.442695, %v834_v62 }
 0x31e   : > { %v786_v0 = vpop.permute.xlu1 %785 }
 0x31f   : > { %2081 = vpow2.f32 %v855_v1  ;;  %v839_v2 = vsub.f32 %v2847_v27, %v786_v0 }
 0x320   : > { %2083 = vpow2.f32 %v851_v4 }
 0x321   : > { %v2078_v18 = vpop.eup %2077  ;;  %v861_v5 = vmul.f32 1.442695, %v839_v2 }
 0x322   : > { %v776_v7 = vpop.permute.xlu1 %775  ;;  %913 = vadd.xlane.f32.xlu1 %v2078_v18 }
 0x323   : > { %2085 = vpow2.f32 %v861_v5  ;;  %v837_v16 = vsub.f32 %v2851_v30, %v776_v7 }
 0x325   : > { %v2080_v60 = vpop.eup %2079  ;;  %v857_v63 = vmul.f32 1.442695, %v837_v16 }
 0x326   : > { %917 = vadd.xlane.f32.xlu0 %v2080_v60 }
 0x327   : > { %2087 = vpow2.f32 %v857_v63 }
 0x329   : > { %v2082_v21 = vpop.eup %2081 }
 0x32a   : > { %v2084_v24 = vpop.eup %2083  ;;  %v781_v12 = vpop.permute.xlu1 %780  ;;  %919 = vadd.xlane.f32.xlu1 %v2082_v21  ;;  %v995_v3 = vpack.c.bf16 %v2082_v21, %v2080_v60 }
 0x32b   : > { %v838_v6 = vsub.f32 %v2857_v37, %v781_v12  ;;  %915 = vadd.xlane.f32.xlu0 %v2084_v24  ;;  %v994_v27 = vpack.c.bf16 %v2084_v24, %v2078_v18 }
 0x32d   : > { %v2086_v11 = vpop.eup %2085  ;;  %v859_v20 = vmul.f32 1.442695, %v838_v6  ;;  %1820 = vmatprep.mubr.bf16.mxu1 %v994_v27 }
 0x32e   : > { %1821 = vmatmul.mubr.bf16.vlgmr.msra.gmra.mrb[0].mxu1 %v995_v3  ;;  %v791_v23 = vpop.permute.xlu1 %790 }
 0x32f   : > { %2089 = vpow2.f32 %v859_v20  ;;  %v840_v30 = vsub.f32 %v2854_v34, %v791_v23  ;;  %925 = vadd.xlane.f32.xlu0 %v2086_v11  ;;  %v749_v23 = vmul.f32 1.442695, %v719_v48 }
 0x331   : > { %v2088_v19 = vpop.eup %2087  ;;  %v863_v25 = vmul.f32 1.442695, %v840_v30  ;;  %v751_v30 = vmul.f32 1.442695, %v720_v26 }
 0x332   : > { %v796_v31 = vpop.permute.xlu1 %795 }
 0x333   : > { %2091 = vpow2.f32 %v863_v25  ;;  %921 = vadd.xlane.f32.xlu0 %v2088_v19  ;;  %v841_v32 = vsub.f32 %v2868_v43, %v796_v31 }
 0x335   : > { %v865_v57 = vmul.f32 1.442695, %v841_v32 }
 0x336   : > { %v806_v49 = vpop.permute.xlu1 %805 }
 0x337   : > { %v843_v37 = vsub.f32 %v2859_v40, %v806_v49 }
 0x339   : > { %v2090_v53 = vpop.eup %2089  ;;  %v869_v55 = vmul.f32 1.442695, %v843_v37 }
 0x33a   : > { %v801_v59 = vpop.permute.xlu0 %800  ;;  %v996_v61 = vpack.c.bf16 %v2090_v53, %v2088_v19 }
 0x33b   : > { %2093 = vpow2.f32 %v869_v55  ;;  %v842_v51 = vsub.f32 %v2875_v45, %v801_v59  ;;  %v881_v59 = vld [vmem:[#allocation3] sm:$0xff] }
 0x33c   : > { %1824 = vmatprep.mubr.bf16.mxu1 %v996_v61  ;;  %2095 = vpow2.f32 %v865_v57  ;;  %v897_v61 = vmul.f32 %v3015_v8, %v881_v59 }
 0x33d   : > { %v2092_v34 = vpop.eup %2091  ;;  %v867_v54 = vmul.f32 1.442695, %v842_v51 }
 0x33e   : > { %927 = vadd.xlane.f32.xlu1 %v2092_v34  ;;  %v811_v56 = vpop.permute.xlu0 %810  ;;  %v997_v62 = vpack.c.bf16 %v2092_v34, %v2086_v11 }
 0x33f   : > { %2097 = vpow2.f32 %v867_v54  ;;  %v844_v43 = vsub.f32 %v2872_v44, %v811_v56  ;;  %v883_v54 = vld [vmem:[#allocation3 + $0x10] sm:$0xff] }
 0x340   : > { %1825 = vmatmul.mubr.bf16.gmra.mrb[4].mxu1 %v997_v62  ;;  %v899_v62 = vmul.f32 %v3024_v14, %v883_v54 }
 0x341   : > { %v871_v40 = vmul.f32 1.442695, %v844_v43 }
 0x342   : > { %v816_v1 = vpop.permute.xlu1 %815  ;;  %923 = vadd.xlane.f32.xlu1 %v2090_v53  ;;  %v821_v4 = vpop.permute.xlu0 %820 }
 0x343   : > { %2099 = vpow2.f32 %v871_v40  ;;  %v845_v0 = vsub.f32 %v2881_v47, %v816_v1  ;;  %v846_v45 = vsub.f32 %v2862_v41, %v821_v4  ;;  %v884_v40 = vld [vmem:[#allocation3 + $0x18] sm:$0xff]  ;;  %v882_v4 = vld [vmem:[#allocation3 + $0x8] sm:$0xff] }
 0x344   : > { %v898_v8 = vmul.f32 %v3017_v10, %v882_v4  ;;  %v888_v10 = vld [vmem:[#allocation3 + $0x38] sm:$0xff]  ;;  %v893_v4 = vld [vmem:[#allocation3 + $0x60] sm:$0xff] }
 0x345   : > { %v2094_v2 = vpop.eup %2093  ;;  %v873_v18 = vmul.f32 1.442695, %v845_v0  ;;  %v875_v5 = vmul.f32 1.442695, %v846_v45  ;;  %v900_v0 = vmul.f32 %v3026_v17, %v884_v40 }
 0x346   : > { %v826_v7 = vpop.permute.xlu1 %825  ;;  %933 = vadd.xlane.f32.xlu0 %v2094_v2  ;;  %v831_v16 = vpop.permute.xlu0 %830 }
 0x347   : > { %2101 = vpow2.f32 %v873_v18  ;;  %v847_v60 = vsub.f32 %v2877_v46, %v826_v7  ;;  %v848_v44 = vsub.f32 %v2864_v42, %v831_v16  ;;  %v2096_v63 = vpop.eup %2095 }
 0x348   : > { %2103 = vpow2.f32 %v875_v5  ;;  %v887_v5 = vld [vmem:[#allocation3 + $0x30] sm:$0xff] }
 0x349   : > { %v2098_v21 = vpop.eup %2097  ;;  %v877_v24 = vmul.f32 1.442695, %v847_v60  ;;  %v879_v12 = vmul.f32 1.442695, %v848_v44  ;;  %v903_v14 = vmul.f32 %v3038_v9, %v887_v5  ;;  %v885_v60 = vld [vmem:[#allocation3 + $0x20] sm:$0xff] }
 0x34a   : > { %929 = vadd.xlane.f32.xlu0 %v2096_v63  ;;  %v998_v47 = vpack.c.bf16 %v2098_v21, %v2096_v63  ;;  %v3090_v31 = vpop.permute.xlu1 %1134  ;;  %v3092_v32 = vpop.permute.xlu0 %1129  ;;  %v901_v17 = vmul.f32 %v3032_v28, %v885_v60  ;;  %v1112_v60 = vld [vmem:[#allocation4 + $0x8] sm:$0xff] }
 0x34b   : > { %2105 = vpow2.f32 %v877_v24  ;;  %v904_v24 = vmul.f32 %v3040_v13, %v888_v10  ;;  %v1208_v10 = vmul.f32 %v3090_v31, %v1112_v60 }
 0x34c   : > { %2107 = vpow2.f32 %v879_v12  ;;  %1828 = vmatprep.mubr.bf16.mxu1 %v998_v47  ;;  %v886_v47 = vld [vmem:[#allocation3 + $0x28] sm:$0xff] }
 0x34d   : > { %v2100_v41 = vpop.eup %2099  ;;  %2109 = vpow2.f32 %v749_v23  ;;  %v902_v9 = vmul.f32 %v3034_v29, %v886_v47  ;;  %v892_v23 = vld [vmem:[#allocation3 + $0x58] sm:$0xff] }
 0x34e   : > { %935 = vadd.xlane.f32.xlu1 %v2100_v41  ;;  %v999_v3 = vpack.c.bf16 %v2100_v41, %v2094_v2  ;;  %2111 = vpow2.f32 %v751_v30  ;;  %v3094_v39 = vpop.permute.xlu1 %1139  ;;  %v3096_v58 = vpop.permute.xlu0 %1144  ;;  %v908_v29 = vmul.f32 %v3046_v35, %v892_v23 }
 0x350   : > { %1829 = vmatmul.mubr.bf16.gmra.mrb[8].mxu1 %v999_v3 }
 0x351   : > { %v2102_v6 = vpop.eup %2101 }
 0x352   : > { %v2104_v27 = vpop.eup %2103  ;;  %931 = vadd.xlane.f32.xlu1 %v2098_v21  ;;  %v3098_v48 = vpop.permute.xlu1 %1149 }
 0x353   : > { %v1000_v46 = vpack.c.bf16 %v2104_v27, %v2102_v6  ;;  %v3100_v15 = vpop.permute.xlu0 %1154 }
 0x355   : > { %v2106_v11 = vpop.eup %2105  ;;  %1832 = vmatprep.mubr.bf16.mxu1 %v1000_v46 }
 0x356   : > { %v2108_v42 = vpop.eup %2107  ;;  %941 = vadd.xlane.f32.xlu0 %v2106_v11  ;;  %v3102_v22 = vpop.permute.xlu1 %1159 }
 0x357   : > { %943 = vadd.xlane.f32.xlu1 %v2108_v42  ;;  %v1001_v20 = vpack.c.bf16 %v2108_v42, %v2106_v11  ;;  %v3084_v19 = vpop.eup %2109  ;;  %v3104_v26 = vpop.permute.xlu0 %1164  ;;  %v889_v11 = vld [vmem:[#allocation3 + $0x40] sm:$0xff] }
 0x358   : > { %v3087_v25 = vpop.eup %2111  ;;  %v905_v13 = vmul.f32 %v3050_v36, %v889_v11 }
 0x359   : > { %1833 = vmatmul.mubr.bf16.gmra.mrb[12].mxu1 %v1001_v20 }
 0x35a   : > { %937 = vadd.xlane.f32.xlu0 %v2102_v6  ;;  %v3106_v49 = vpop.permute.xlu1 %1179  ;;  %v891_v6 = vld [vmem:[#allocation3 + $0x50] sm:$0xff] }
 0x35b   : > { %939 = vadd.xlane.f32.xlu1 %v2104_v27  ;;  %v3108_v37 = vpop.permute.xlu0 %1184  ;;  %v907_v28 = vmul.f32 %v3044_v33, %v891_v6 }
 0x35e   : > { %v3110_v53 = vpop.permute.xlu1 %1169 }
 0x35f   : > { %v3112_v55 = vpop.permute.xlu0 %1174 }
 0x362   : > { %v3114_v57 = vpop.permute.xlu1 %1189 }
 0x363   : > { %v3117_v51 = vpop.permute.xlu0 %1194 }
 0x36c   : > { %1199 = vperm.xlu1 %2041, %v3084_v19  }
 0x370   : > { %1204 = vperm.xlu0 %2042, %v3087_v25  }
 0x3af   : > { %v914_v34 = vpop.xlane.xlu1 %913 }
 0x3b0   : > { %v945_v56 = vadd.f32 %v914_v34, %v897_v61  ;;  %v890_v61 = vld [vmem:[#allocation3 + $0x48] sm:$0xff] }
 0x3b1   : > { %v906_v33 = vmul.f32 %v3052_v38, %v890_v61  ;;  %v909_v38 = vmul.f32 %v3058_v52, %v893_v4  ;;  %v1120_v61 = vld [vmem:[#allocation4 + $0x48] sm:$0xff] }
 0x3b2   : > { %962 = vst.msk [vmem:[#allocation3] sm:$0xff] %vm961_vm3, %v945_v56  ;;  %v895_v56 = vld [vmem:[#allocation3 + $0x70] sm:$0xff] }
 0x3b3   : > { %v918_v43 = vpop.xlane.xlu0 %917  ;;  %v911_v36 = vmul.f32 %v3084_v19, %v895_v56 }
 0x3b4   : > { %v947_v1 = vadd.f32 %v918_v43, %v899_v62  ;;  %v896_v43 = vld [vmem:[#allocation3 + $0x78] sm:$0xff] }
 0x3b5   : > { %v912_v40 = vmul.f32 %v3087_v25, %v896_v43  ;;  %v1113_v25 = vld [vmem:[#allocation4 + $0x10] sm:$0xff] }
 0x3b6   : > { %964 = vst.msk [vmem:[#allocation3 + $0x10] sm:$0xff] %vm961_vm3, %v947_v1 }
 0x3b7   : > { %v920_v45 = vpop.xlane.xlu1 %919 }
 0x3b8   : > { %v948_v2 = vadd.f32 %v920_v45, %v900_v0  ;;  %v916_v18 = vpop.xlane.xlu0 %915  ;;  %v894_v45 = vld [vmem:[#allocation3 + $0x68] sm:$0xff] }
 0x3b9   : > { %v946_v7 = vadd.f32 %v916_v18, %v898_v8 }
 0x3ba   : > { %965 = vst.msk [vmem:[#allocation3 + $0x18] sm:$0xff] %vm961_vm3, %v948_v2  ;;  %v910_v2 = vmul.f32 %v3056_v50, %v894_v45  ;;  %v1124_v45 = vld [vmem:[#allocation4 + $0x68] sm:$0xff] }
 0x3bb   : > { %963 = vst.msk [vmem:[#allocation3 + $0x8] sm:$0xff] %vm961_vm3, %v946_v7 }
 0x3bc   : > { %v926_v16 = vpop.xlane.xlu0 %925 }
 0x3bd   : > { %v951_v44 = vadd.f32 %v926_v16, %v903_v14  ;;  %v1111_v14 = vld [vmem:[#allocation4] sm:$0xff]  ;;  %v1114_v16 = vld [vmem:[#allocation4 + $0x18] sm:$0xff] }
 0x3be   : > { %v1207_v52 = vmul.f32 %v3092_v32, %v1111_v14  ;;  %v1117_v32 = vld [vmem:[#allocation4 + $0x30] sm:$0xff] }
 0x3bf   : > { %968 = vst.msk [vmem:[#allocation3 + $0x30] sm:$0xff] %vm961_vm3, %v951_v44  ;;  %v1209_v44 = vmul.f32 %v3094_v39, %v1113_v25  ;;  %v1115_v39 = vld [vmem:[#allocation4 + $0x20] sm:$0xff]  ;;  %v1213_v6 = vmul.f32 %v3102_v22, %v1117_v32 }
 0x3c0   : > { %v922_v63 = vpop.xlane.xlu0 %921  ;;  %v1211_v31 = vmul.f32 %v3098_v48, %v1115_v39  ;;  %v1121_v48 = vld [vmem:[#allocation4 + $0x50] sm:$0xff]  ;;  %v1119_v22 = vld [vmem:[#allocation4 + $0x40] sm:$0xff] }
 0x3c1   : > { %v949_v21 = vadd.f32 %v922_v63, %v901_v17  ;;  %v1210_v63 = vmul.f32 %v3096_v58, %v1114_v16  ;;  %v1118_v58 = vld [vmem:[#allocation4 + $0x38] sm:$0xff] }
 0x3c3   : > { %966 = vst.msk [vmem:[#allocation3 + $0x20] sm:$0xff] %vm961_vm3, %v949_v21 }
 0x3cb   : > { %v928_v12 = vpop.xlane.xlu1 %927 }
 0x3cc   : > { %v952_v41 = vadd.f32 %v928_v12, %v904_v24 }
 0x3ce   : > { %969 = vst.msk [vmem:[#allocation3 + $0x38] sm:$0xff] %vm961_vm3, %v952_v41 }
 0x3cf   : > { %v924_v3 = vpop.xlane.xlu1 %923 }
 0x3d0   : > { %v950_v27 = vadd.f32 %v924_v3, %v902_v9  ;;  %v1116_v3 = vld [vmem:[#allocation4 + $0x28] sm:$0xff] }
 0x3d2   : > { %967 = vst.msk [vmem:[#allocation3 + $0x28] sm:$0xff] %vm961_vm3, %v950_v27 }
 0x3d3   : > { %v934_v46 = vpop.xlane.xlu0 %933 }
 0x3d4   : > { %v955_v42 = vadd.f32 %v934_v46, %v907_v28  ;;  %v1214_v28 = vmul.f32 %v3104_v26, %v1118_v58  ;;  %v1122_v26 = vld [vmem:[#allocation4 + $0x58] sm:$0xff] }
 0x3d6   : > { %972 = vst.msk [vmem:[#allocation3 + $0x50] sm:$0xff] %vm961_vm3, %v955_v42  ;;  %v1212_v42 = vmul.f32 %v3100_v15, %v1116_v3  ;;  %v1215_v15 = vmul.f32 %v3110_v53, %v1119_v22  ;;  %v1123_v53 = vld [vmem:[#allocation4 + $0x60] sm:$0xff] }
 0x3d7   : > { %v930_v20 = vpop.xlane.xlu0 %929 }
 0x3d8   : > { %v953_v30 = vadd.f32 %v930_v20, %v905_v13 }
 0x3da   : > { %970 = vst.msk [vmem:[#allocation3 + $0x40] sm:$0xff] %vm961_vm3, %v953_v30 }
 0x3db   : > { %v936_v59 = vpop.xlane.xlu1 %935 }
 0x3dc   : > { %v956_v34 = vadd.f32 %v936_v59, %v908_v29  ;;  %v1217_v59 = vmul.f32 %v3106_v49, %v1121_v48  ;;  %v1125_v49 = vld [vmem:[#allocation4 + $0x70] sm:$0xff] }
 0x3dd   : > { %v1285_v3 = vld [vmem:[#allocation3 + $0x50] sm:$0xff] (!%p1736_p1) }
 0x3de   : > { %973 = vst.msk [vmem:[#allocation3 + $0x58] sm:$0xff] %vm961_vm3, %v956_v34 }
 0x3df   : > { %v932_v54 = vpop.xlane.xlu1 %931 }
 0x3e0   : > { %v954_v62 = vadd.f32 %v932_v54, %v906_v33  ;;  %v1218_v33 = vmul.f32 %v3108_v37, %v1122_v26  ;;  %v1126_v37 = vld [vmem:[#allocation4 + $0x78] sm:$0xff] }
 0x3e2   : > { %971 = vst.msk [vmem:[#allocation3 + $0x48] sm:$0xff] %vm961_vm3, %v954_v62  ;;  %v1216_v62 = vmul.f32 %v3112_v55, %v1120_v61  ;;  %v1404_v61 = vld [vmem:[%s3384_s16] sm:$0xf] (!%p1736_p1) }
 0x3e3   : > { %v942_v1 = vpop.xlane.xlu0 %941 }
 0x3e4   : > { %v944_v35 = vpop.xlane.xlu1 %943  ;;  %v959_v0 = vadd.f32 %v942_v1, %v911_v36 }
 0x3e5   : > { %v960_v8 = vadd.f32 %v944_v35, %v912_v40  ;;  %v1286_v39 = vld [vmem:[#allocation3 + $0x58] sm:$0xff] (!%p1736_p1) }
 0x3e6   : > { %976 = vst.msk [vmem:[#allocation3 + $0x70] sm:$0xff] %vm961_vm3, %v959_v0 }
 0x3e7   : > { %977 = vst.msk [vmem:[#allocation3 + $0x78] sm:$0xff] %vm961_vm3, %v960_v8  ;;  %v938_v18 = vpop.xlane.xlu0 %937  ;;  %v1219_v8 = vmul.f32 %v3114_v57, %v1123_v53  ;;  %v1277_v57 = vld [vmem:[#allocation3 + $0x10] sm:$0xff] (!%p1736_p1) }
 0x3e8   : > { %v940_v5 = vpop.xlane.xlu1 %939  ;;  %v957_v7 = vadd.f32 %v938_v18, %v909_v38  ;;  %2115 = vrcp.f32 (!%p1736_p1), %v1277_v57 }
 0x3e9   : > { %v958_v19 = vadd.f32 %v940_v5, %v910_v2 }
 0x3ea   : > { %974 = vst.msk [vmem:[#allocation3 + $0x60] sm:$0xff] %vm961_vm3, %v957_v7  ;;  %v1220_v7 = vmul.f32 %v3117_v51, %v1124_v45  ;;  %v2390_v51 = vmov (!%p1736_p1), 0  }
 0x3eb   : > { %975 = vst.msk [vmem:[#allocation3 + $0x68] sm:$0xff] %vm961_vm3, %v958_v19  ;;  %2114 = vset.pattern.permute.xlu1 (!%p1736_p1), %v2390_v51  ;;  %2113 = vset.pattern.permute.xlu0 (!%p1736_p1), %v2390_v51 }
 0x3ec   : > { %v1200_v35 = vpop.permute.xlu1 %1199 }
 0x3ed   : > { %v1221_v55 = vmul.f32 %v1200_v35, %v1125_v49 }
 0x3ef   : > { %v1205_v0 = vpop.permute.xlu0 %1204 }
 0x3f0   : > { %v1222_v2 = vmul.f32 %v1205_v0, %v1126_v37 }
 0x401   : > { %v1822_v17 = vpop.f32.mrb[0].mxu1 }
 0x402   : > { %v1225_v50 = vadd.f32 %v1822_v17, %v1209_v44  ;;  %v1048_v21 = vpop.f32.mrb[1].mxu1  ;;  %v1275_v44 = vld [vmem:[#allocation3] sm:$0xff] (!%p1736_p1)  ;;  %v1276_v17 = vld [vmem:[#allocation3 + $0x8] sm:$0xff] (!%p1736_p1) }
 0x403   : > { %v1223_v24 = vadd.f32 %v1207_v52, %v1048_v21  ;;  %v1823_v12 = vpop.f32.mrb[2].mxu1  ;;  %v1278_v52 = vld [vmem:[#allocation3 + $0x18] sm:$0xff] (!%p1736_p1)  ;;  %2117 = vrcp.f32 (!%p1736_p1), %v1275_v44 }
 0x404   : > { %1241 = vst.msk [vmem:[#allocation4 + $0x10] sm:$0xff] %vm519_vm2, %v1225_v50  ;;  %v1226_v47 = vadd.f32 %v1823_v12, %v1210_v63  ;;  %v1051_v41 = vpop.f32.mrb[3].mxu1  ;;  %2119 = vrcp.f32 (!%p1736_p1), %v1278_v52  ;;  %v1280_v63 = vld [vmem:[#allocation3 + $0x28] sm:$0xff] (!%p1736_p1)  ;;  %v1279_v50 = vld [vmem:[#allocation3 + $0x20] sm:$0xff] (!%p1736_p1)  ;;  %v1282_v21 = vld [vmem:[#allocation3 + $0x38] sm:$0xff] (!%p1736_p1) }
 0x405   : > { %1239 = vst.msk [vmem:[#allocation4] sm:$0xff] %vm519_vm2, %v1223_v24  ;;  %v1224_v9 = vadd.f32 %v1208_v10, %v1051_v41  ;;  %2121 = vrcp.f32 (!%p1736_p1), %v1276_v17  ;;  %v1281_v10 = vld [vmem:[#allocation3 + $0x30] sm:$0xff] (!%p1736_p1)  ;;  %v2116_v24 = vpop.eup (!%p1736_p1), %2115 }
 0x406   : > { %1242 = vst.msk [vmem:[#allocation4 + $0x18] sm:$0xff] %vm519_vm2, %v1226_v47  ;;  %2123 = vrcp.f32 (!%p1736_p1), %v1280_v63  ;;  %1319 = vperm.xlu1 (!%p1736_p1), %2114, %v2116_v24   ;;  %v1284_v47 = vld [vmem:[#allocation3 + $0x48] sm:$0xff] (!%p1736_p1) }
 0x407   : > { %1240 = vst.msk [vmem:[#allocation4 + $0x8] sm:$0xff] %vm519_vm2, %v1224_v9  ;;  %2125 = vrcp.f32 (!%p1736_p1), %v1279_v50  ;;  %v1283_v9 = vld [vmem:[#allocation3 + $0x40] sm:$0xff] (!%p1736_p1) }
 0x408   : > { %2127 = vrcp.f32 (!%p1736_p1), %v1282_v21 }
 0x409   : > { %2129 = vrcp.f32 (!%p1736_p1), %v1281_v10 }
 0x40a   : > { %2131 = vrcp.f32 (!%p1736_p1), %v1284_v47 }
 0x40b   : > { %2133 = vrcp.f32 (!%p1736_p1), %v1283_v9 }
 0x40c   : > { %2135 = vrcp.f32 (!%p1736_p1), %v1286_v39 }
 0x40d   : > { %v2118_v12 = vpop.eup (!%p1736_p1), %2117  ;;  %2137 = vrcp.f32 (!%p1736_p1), %v1285_v3  ;;  %v1262_v49 = vld [vmem:[#allocation4 + $0x18] sm:$0xff] (!%p1736_p1) }
 0x40e   : > { %v2120_v41 = vpop.eup (!%p1736_p1), %2119  ;;  %1309 = vperm.xlu0 (!%p1736_p1), %2113, %v2118_v12  }
 0x40f   : > { %v2122_v32 = vpop.eup (!%p1736_p1), %2121  ;;  %1324 = vperm.xlu1 (!%p1736_p1), %2114, %v2120_v41  }
 0x410   : > { %v2124_v58 = vpop.eup (!%p1736_p1), %2123 }
 0x412   : > { %1314 = vperm.xlu0 (!%p1736_p1), %2113, %v2122_v32  }
 0x413   : > { %v1826_v27 = vpop.f32.mrb[4].mxu1  ;;  %1334 = vperm.xlu1 (!%p1736_p1), %2114, %v2124_v58  }
 0x414   : > { %v1229_v46 = vadd.f32 %v1826_v27, %v1213_v6  ;;  %v1064_v11 = vpop.f32.mrb[5].mxu1  ;;  %v2126_v6 = vpop.eup (!%p1736_p1), %2125  ;;  %v2391_v27 = vmov (!%p1736_p1), 0.0|0.0  }
 0x415   : > { %v1227_v13 = vadd.f32 %v1211_v31, %v1064_v11  ;;  %v1827_v20 = vpop.f32.mrb[6].mxu1  ;;  %v1288_v31 = vld [vmem:[#allocation3 + $0x68] sm:$0xff] (!%p1736_p1)  ;;  %1871 = vmatprep.subr.bf16.mxu0 (!%p1736_p1), %v2391_v27 }
 0x416   : > { %1245 = vst.msk [vmem:[#allocation4 + $0x30] sm:$0xff] %vm519_vm2, %v1229_v46  ;;  %v1230_v23 = vadd.f32 %v1827_v20, %v1214_v28  ;;  %v1067_v30 = vpop.f32.mrb[7].mxu1  ;;  %v2128_v28 = vpop.eup (!%p1736_p1), %2127  ;;  %1329 = vperm.xlu0 (!%p1736_p1), %2113, %v2126_v6   ;;  %v1287_v46 = vld [vmem:[#allocation3 + $0x60] sm:$0xff] (!%p1736_p1)  ;;  %2139 = vrcp.f32 (!%p1736_p1), %v1288_v31  ;;  %v1289_v20 = vld [vmem:[#allocation3 + $0x70] sm:$0xff] (!%p1736_p1) }
 0x417   : > { %1243 = vst.msk [vmem:[#allocation4 + $0x20] sm:$0xff] %vm519_vm2, %v1227_v13  ;;  %v1228_v29 = vadd.f32 %v1212_v42, %v1067_v30  ;;  %v2130_v11 = vpop.eup (!%p1736_p1), %2129  ;;  %1344 = vperm.xlu1 (!%p1736_p1), %2114, %v2128_v28   ;;  %2141 = vrcp.f32 (!%p1736_p1), %v1287_v46  ;;  %v1290_v42 = vld [vmem:[#allocation3 + $0x78] sm:$0xff] (!%p1736_p1) }
 0x418   : > { %1246 = vst.msk [vmem:[#allocation4 + $0x38] sm:$0xff] %vm519_vm2, %v1230_v23  ;;  %v2132_v13 = vpop.eup (!%p1736_p1), %2131  ;;  %2143 = vrcp.f32 (!%p1736_p1), %v1290_v42 }
 0x419   : > { %1244 = vst.msk [vmem:[#allocation4 + $0x28] sm:$0xff] %vm519_vm2, %v1228_v29  ;;  %v2134_v23 = vpop.eup (!%p1736_p1), %2133  ;;  %2145 = vrcp.f32 (!%p1736_p1), %v1289_v20 }
 0x41a   : > { %1339 = vperm.xlu0 (!%p1736_p1), %2113, %v2130_v11   ;;  %v2136_v30 = vpop.eup (!%p1736_p1), %2135 }
 0x41b   : > { %1354 = vperm.xlu1 (!%p1736_p1), %2114, %v2132_v13   ;;  %v2138_v29 = vpop.eup (!%p1736_p1), %2137 }
 0x41e   : > { %1349 = vperm.xlu0 (!%p1736_p1), %2113, %v2134_v23  }
 0x41f   : > { %1364 = vperm.xlu1 (!%p1736_p1), %2114, %v2136_v30  }
 0x420   : > { %v2140_v48 = vpop.eup (!%p1736_p1), %2139 }
 0x421   : > { %v2142_v22 = vpop.eup (!%p1736_p1), %2141 }
 0x422   : > { %1359 = vperm.xlu0 (!%p1736_p1), %2113, %v2138_v29   ;;  %v2144_v26 = vpop.eup (!%p1736_p1), %2143 }
 0x423   : > { %v1830_v34 = vpop.f32.mrb[8].mxu1  ;;  %1374 = vperm.xlu1 (!%p1736_p1), %2114, %v2140_v48   ;;  %v1403_v48 = vld [vmem:[%s3387_s14] sm:$0xf] (!%p1736_p1) }
 0x424   : > { %v1233_v54 = vadd.f32 %v1830_v34, %v1217_v59  ;;  %v1080_v56 = vpop.f32.mrb[9].mxu1  ;;  %v2146_v59 = vpop.eup (!%p1736_p1), %2145 }
 0x425   : > { %v1231_v43 = vadd.f32 %v1215_v15, %v1080_v56  ;;  %v1831_v36 = vpop.f32.mrb[10].mxu1  ;;  %v2393_v15 = vmov (!%p1736_p1), 0.0  }
 0x426   : > { %1249 = vst.msk [vmem:[#allocation4 + $0x50] sm:$0xff] %vm519_vm2, %v1233_v54  ;;  %v1234_v40 = vadd.f32 %v1831_v36, %v1218_v33  ;;  %v1083_v1 = vpop.f32.mrb[11].mxu1  ;;  %1369 = vperm.xlu0 (!%p1736_p1), %2113, %v2142_v22   ;;  %1868 = vmatprep.mubr.msk.f32.mxu0 (!%p1736_p1), %vm2392_vm4, %v2393_v15  ;;  %v1259_v33 = vld [vmem:[#allocation4] sm:$0xff] (!%p1736_p1)  ;;  %v1260_v54 = vld [vmem:[#allocation4 + $0x8] sm:$0xff] (!%p1736_p1) }
 0x427   : > { %1247 = vst.msk [vmem:[#allocation4 + $0x40] sm:$0xff] %vm519_vm2, %v1231_v43  ;;  %v1232_v4 = vadd.f32 %v1216_v62, %v1083_v1  ;;  %1384 = vperm.xlu1 (!%p1736_p1), %2114, %v2144_v26  }
 0x428   : > { %1250 = vst.msk [vmem:[#allocation4 + $0x58] sm:$0xff] %vm519_vm2, %v1234_v40 }
 0x429   : > { %1248 = vst.msk [vmem:[#allocation4 + $0x48] sm:$0xff] %vm519_vm2, %v1232_v4  ;;  %v1261_v4 = vld [vmem:[#allocation4 + $0x10] sm:$0xff] (!%p1736_p1) }
 0x42a   : > { %1379 = vperm.xlu0 (!%p1736_p1), %2113, %v2146_v59  }
 0x42c   : > { %v1834_v38 = vpop.f32.mrb[12].mxu1  ;;  %1258 = sbr.rel (%p1736_p1) target bundleno = 1452 (0x5ac), region = 64 }
 0x42d   : > { %v1237_v18 = vadd.f32 %v1834_v38, %v1221_v55  ;;  %v1096_v5 = vpop.f32.mrb[13].mxu1  ;;  %v1264_v55 = vld [vmem:[#allocation4 + $0x28] sm:$0xff] (!%p1736_p1)  ;;  %v1263_v38 = vld [vmem:[#allocation4 + $0x20] sm:$0xff] (!%p1736_p1)  ;;  %v1269_v47 = vld [vmem:[#allocation4 + $0x50] sm:$0xff] (!%p1736_p1) }
 0x42e   : > { %v1235_v19 = vadd.f32 %v1219_v8, %v1096_v5  ;;  %v1835_v25 = vpop.f32.mrb[14].mxu1  ;;  %1407 = vperm.xlu0 (!%p1736_p1), %2113, %v1404_v61   ;;  %v1267_v17 = vld [vmem:[#allocation4 + $0x40] sm:$0xff] (!%p1736_p1) }
 0x42f   : > { %1253 = vst.msk [vmem:[#allocation4 + $0x70] sm:$0xff] %vm519_vm2, %v1237_v18  ;;  %v1238_v14 = vadd.f32 %v1835_v25, %v1222_v2  ;;  %v1099_v16 = vpop.f32.mrb[15].mxu1  ;;  %v1270_v24 = vld [vmem:[#allocation4 + $0x58] sm:$0xff] (!%p1736_p1) }
 0x430   : > { %1251 = vst.msk [vmem:[#allocation4 + $0x60] sm:$0xff] %vm519_vm2, %v1235_v19  ;;  %v1236_v60 = vadd.f32 %v1220_v7, %v1099_v16  ;;  %v1266_v19 = vld [vmem:[#allocation4 + $0x38] sm:$0xff] (!%p1736_p1)  ;;  %v1268_v52 = vld [vmem:[#allocation4 + $0x48] sm:$0xff] (!%p1736_p1) }
 0x431   : > { %1254 = vst.msk [vmem:[#allocation4 + $0x78] sm:$0xff] %vm519_vm2, %v1238_v14  ;;  %v1265_v14 = vld [vmem:[#allocation4 + $0x30] sm:$0xff] (!%p1736_p1) }
 0x432   : > { %1252 = vst.msk [vmem:[#allocation4 + $0x68] sm:$0xff] %vm519_vm2, %v1236_v60 }
 0x436   : > { %v1273_v20 = vld [vmem:[#allocation4 + $0x70] sm:$0xff] }
 0x437   : > { %v1271_v6 = vld [vmem:[#allocation4 + $0x60] sm:$0xff] }
 0x438   : > { %v1274_v42 = vld [vmem:[#allocation4 + $0x78] sm:$0xff] }
 0x439   : > { %v1272_v58 = vld [vmem:[#allocation4 + $0x68] sm:$0xff] }
 0x485   : > { %v1320_v56 = vpop.permute.xlu1 %1319 }
 0x486   : > { %v1389_v53 = vmul.f32 %v1320_v56, %v1261_v4 }
 0x48d   : > { %v1310_v34 = vpop.permute.xlu0 %1309 }
 0x48e   : > { %v1387_v43 = vmul.f32 %v1310_v34, %v1259_v33  ;;  %v1325_v35 = vpop.permute.xlu1 %1324 }
 0x48f   : > { %v1390_v37 = vmul.f32 %v1325_v35, %v1262_v49 }
 0x491   : > { %v1315_v62 = vpop.permute.xlu0 %1314  ;;  %v1876_v0 = vpack.c.bf16 %v1390_v37, %v1389_v53 }
 0x492   : > { %v1388_v36 = vmul.f32 %v1315_v62, %v1260_v54  ;;  %v1335_v45 = vpop.permute.xlu1 %1334 }
 0x493   : > { %v1392_v2 = vmul.f32 %v1335_v45, %v1264_v55 }
 0x494   : > { %v1872_v1 = vpack.c.bf16 %v1388_v36, %v1387_v43 }
 0x495   : > { %v1330_v8 = vpop.permute.xlu0 %1329 }
 0x496   : > { %1874 = vmatpush3.bf16.xpose.msk.msra.mxu0 %vm3187_vm5, %v1872_v1  ;;  %v1391_v18 = vmul.f32 %v1330_v8, %v1263_v38  ;;  %v1345_v7 = vpop.permute.xlu1 %1344 }
 0x497   : > { %1875 = vmatprep.subr.bf16.mxu0 %v2391_v27  ;;  %v1394_v16 = vmul.f32 %v1345_v7, %v1266_v19 }
 0x498   : > { %v1880_v5 = vpack.c.bf16 %v1392_v2, %v1391_v18 }
 0x499   : > { %v1340_v25 = vpop.permute.xlu0 %1339 }
 0x49a   : > { %v1393_v60 = vmul.f32 %v1340_v25, %v1265_v14  ;;  %v1355_v44 = vpop.permute.xlu1 %1354 }
 0x49b   : > { %v1396_v63 = vmul.f32 %v1355_v44, %v1268_v52 }
 0x49c   : > { %v1884_v57 = vpack.c.bf16 %v1394_v16, %v1393_v60 }
 0x49d   : > { %v1350_v51 = vpop.permute.xlu0 %1349 }
 0x49e   : > { %1878 = vmatpush3.bf16.xpose.msk.msra.mxu0 %vm3187_vm5, %v1876_v0  ;;  %v1395_v50 = vmul.f32 %v1350_v51, %v1267_v17  ;;  %v1365_v10 = vpop.permute.xlu1 %1364 }
 0x49f   : > { %1879 = vmatprep.subr.bf16.mxu0 %v2391_v27  ;;  %v1398_v41 = vmul.f32 %v1365_v10, %v1270_v24 }
 0x4a0   : > { %v1888_v21 = vpack.c.bf16 %v1396_v63, %v1395_v50 }
 0x4a1   : > { %v1360_v12 = vpop.permute.xlu0 %1359 }
 0x4a2   : > { %v1397_v9 = vmul.f32 %v1360_v12, %v1269_v47  ;;  %v1375_v39 = vpop.permute.xlu1 %1374 }
 0x4a3   : > { %v1400_v31 = vmul.f32 %v1375_v39, %v1272_v58 }
 0x4a4   : > { %v1892_v32 = vpack.c.bf16 %v1398_v41, %v1397_v9 }
 0x4a5   : > { %v1370_v3 = vpop.permute.xlu0 %1369 }
 0x4a6   : > { %1882 = vmatpush3.bf16.xpose.msk.msra.mxu0 %vm3187_vm5, %v1880_v5  ;;  %v1399_v28 = vmul.f32 %v1370_v3, %v1271_v6  ;;  %v1385_v11 = vpop.permute.xlu1 %1384 }
 0x4a7   : > { %1883 = vmatprep.subr.bf16.mxu0 %v2391_v27  ;;  %v1402_v23 = vmul.f32 %v1385_v11, %v1274_v42 }
 0x4a8   : > { %v1896_v46 = vpack.c.bf16 %v1400_v31, %v1399_v28 }
 0x4a9   : > { %v1380_v13 = vpop.permute.xlu0 %1379 }
 0x4aa   : > { %v1401_v30 = vmul.f32 %v1380_v13, %v1273_v20 }
 0x4ac   : > { %v1900_v29 = vpack.c.bf16 %v1402_v23, %v1401_v30 }
 0x4ad   : > { %v1408_v22 = vpop.permute.xlu0 %1407 }
 0x4ae   : > { %1886 = vmatpush3.bf16.xpose.msk.msra.mxu0 %vm3187_vm5, %v1884_v57 }
 0x4af   : > { %1887 = vmatprep.subr.bf16.mxu0 %v2391_v27 }
 0x4b6   : > { %1890 = vmatpush3.bf16.xpose.msk.msra.mxu0 %vm3187_vm5, %v1888_v21 }
 0x4b7   : > { %1891 = vmatprep.subr.bf16.mxu0 %v2391_v27 }
 0x4be   : > { %1894 = vmatpush3.bf16.xpose.msk.msra.mxu0 %vm3187_vm5, %v1892_v32 }
 0x4bf   : > { %1895 = vmatprep.subr.bf16.mxu0 %v2391_v27 }
 0x4c6   : > { %1898 = vmatpush3.bf16.xpose.msk.msra.mxu0 %vm3187_vm5, %v1896_v46 }
 0x4c7   : > { %1899 = vmatprep.subr.bf16.mxu0 %v2391_v27 }
 0x4ce   : > { %1902 = vmatpush3.bf16.xpose.msk.msra.mxu0 %vm3187_vm5, %v1900_v29 }
 0x4d5   : > { %1869 = vmatmul.mubr.msk.f32.vlgmr.msra.gmra.mrb[0].mxu0 %vm519_vm2, %v1403_v48 }
 0x5a8   : > { %v1527_v26 = vpop.f32.mrb[0].mxu0 }
 0x5a9   : > { %v1528_v59 = vadd.f32 %v1527_v26, %v1408_v22  ;;  %v1870_v61 = vpop.f32.mrb[1].mxu0 }
 0x5ab   : > { %1531 = vst [vmem:[%s2766_s22] sm:$0xf] %v1528_v59 }
 0x5ac PF: > { %s3388_s8 = sld [smem:[#allocation19_spill]]  ;;  %s3389_s27 = sld [smem:[#allocation18_spill]] }
 0x5ad   : > { %s3390_s3 = sld [smem:[#allocation26_spill]]  ;;  %s1548_s5 = sshll.u32 %s2766_s22, 4  ;;  %s3222_s5 = int_to_ptr.vmem [resolvable:$true] %s1548_s5 }
 0x5ae   : > { %s3391_s20 = sld [smem:[#allocation33_spill]]  ;;  %s1533_s12 = scalar_lea.sflag [#allocation7], %s2735_s19 }
 0x5af   : > { %s2237_s13 = scalar_lea.vmem %s3222_s5, 64  ;;  %s2394_s29 = smov [#allocation11]  }
 0x5b0   : > { %p2238_p7 = scmp.ne.s32.totalorder %s3222_s5, %s2237_s13  ;;  %s2241_s15 = sshll.u32 %s2394_s29, 4  ;;  %s2242_s15 = int_to_ptr.vmem [resolvable:$false] %s2241_s15 }
 0x5b1   : > { %s2243_s22 = scalar_lea.vmem %s2242_s15, 128  ;;  %p2244_p4 = scmp.lt.s32.totalorder %s3222_s5, %s2242_s15 }
 0x5b2   : > { %s1755_s4 = sshll.u32 %s3388_s8, 1  ;;  %p2245_p2 = scmp.lt.s32.totalorder %s2243_s22, %s2237_s13 }
 0x5b3   : > { %s1544_s21 = sadd.s32 %s3389_s27, %s1755_s4  ;;  %p3392_p9 = scmp.ne.s32.totalorder %s3390_s3, 0 }
 0x5b4   : > { %s1756_s6 = sshll.u32 %s1544_s21, 6  ;;  %p2246_p8 = por %p2245_p2, %p2244_p4 }
 0x5b5   : > { %s1546_s28 = scalar_lea.hbm %s3391_s20, %s1756_s6  ;;  %p2239_p5 = pnand %p2238_p7, %p3392_p9 }
 0x5b7   : > { %p2240_p10 = pneg %p2239_p5 }
 0x5b9   : > { %p2247_p6 = pnand %p2246_p8, %p2240_p10 }
 0x5bb   : > { %2250 = shalt.err (!%p2247_p6)
}
 0x5bc   : > { %s2251_s16 = scalar_lea.hbm %s1546_s28, 64  ;;  %s2255_s18 = scalar_lea.hbm %s3391_s20, 256 }
 0x5bd   : > { %p2252_p0 = scmp.ne.s32.totalorder %s1546_s28, %s2251_s16  ;;  %p2256_p12 = scmp.lt.u32.totalorder %s1546_s28, %s3391_s20 }
 0x5be   : > { %p2257_p3 = scmp.lt.u32.totalorder %s2255_s18, %s2251_s16  ;;  %p2259_p7 = scmp.lt.u32.totalorder %s2251_s16, %s1546_s28 }
 0x5bf   : > { %p2253_p11 = pnand %p2252_p0, %p3392_p9 }
 0x5c0   : > { %p2258_p1 = por %p2257_p3, %p2256_p12 }
 0x5c1   : > { %p2254_p13 = pneg %p2253_p11 }
 0x5c2   : > { %p2260_p5 = por %p2259_p7, %p2258_p1 }
 0x5c4   : > { %p2261_p10 = pnand %p2260_p5, %p2254_p13 }
 0x5c6   : > { %2264 = shalt.err (!%p2261_p10)
}
 0x5c7   : > { %1909 = dma.vmem_to_hbm [thread:$0]  (%p3392_p9), %s3222_s5, 64, %s1546_s28, %s1533_s12  }
 0x5c8 PF: > { %s3393_s27 = sld [smem:[#allocation16_spill]]  ;;  %p1926_p4 = scmp.ge.s32.totalorder %s2379_s9, 2 }
 0x5c9   : > { %s3394_s4 = sld [smem:[#allocation28_spill]] }
 0x5ce   : > { %s1560_s21 = sand.u32 1, %s3393_s27  }
 0x5cf   : > { %p3395_p2 = scmp.ne.s32.totalorder %s3394_s4, 0  ;;  %s1561_s6 = scalar_lea.sflag [#allocation7], %s1560_s21 }
 0x5d1   : > { %p1922_p8 = pnand %p1926_p4, %p3395_p2 }
 0x5d3   : > { %2326 = dma.done.wait (!%p1922_p8), %s1561_s6, 64  }
 0x5d4   : > { %2328 = vsyncadd (!%p1922_p8), %s1561_s6, 4294967232  ;;  %s25_s9 = sadd.s32 1, %s2379_s9   ;;  %s3397_s21 = sld [smem:[#allocation15_spill]] }
 0x5d5   : > { %p3249_p6 = scmp.ge.s32.totalorder %s25_s9, 10   ;;  %s3398_s28 = sld [smem:[#allocation20_spill]] }
 0x5d6   : > { %s3399_s29 = sld [smem:[#allocation21_spill]]  ;;  %s3400_s3 = sld [smem:[#allocation25_spill]] }
 0x5d7   : > { %s3401_s8 = sld [smem:[#allocation27_spill]]  ;;  %s3402_s22 = smov %s2339_s23 }
 0x5d8   : > { %s3403_s23 = smov %s2655_s10  ;;  %s3404_s24 = smov %s2347_s25 }
 0x5d9   : > { %s3405_s25 = smov %s2351_s26  ;;  %s3406_s26 = smov %s2650_s7 }
 0x5da   : > { %s3407_s27 = smov %s2367_s30  ;;  %s3408_s30 = smov %s3411_s11 }
 0x5db   :  { %24 = sbr.rel (!%p3249_p6) target bundleno = 18 (0x12), region = 124 }
 0x5dc   : > { %s3409_s7 = smov %s3400_s3 }
 0x5e2   :  { %1566 = vsyncpa [#allocation6], 1 }
 0x5e3   :  { %1568 = vsyncpa [#allocation6 + $0x1], 1 }
 0x5e4   :  { %1569 = vsyncpa [#allocation9], 1 }
 0x5e5   :  { %1571 = vsyncpa [#allocation9 + $0x1], 1 }
 0x5e6   :  { %1572 = vsyncpa [#allocation7], 1 }
 0x5e7   :  { %1574 = vsyncpa [#allocation7 + $0x1], 1 }

</bundles_post_ra>
